<compile_context>
chip_gen: v7x
topology: tpu7x:2x2x1
jax: 0.10.0
libtpu: 0.0.40
codegen_flags: <defaults>
</compile_context>

<pallas_src>
import functools
import math

import jax
import jax.numpy as jnp
from jax.experimental import pallas as pl
from jax.experimental.pallas import tpu as pltpu


def _round_up(x, m):
    return (x + m - 1) // m * m


def _vmem_budget_bytes():
    """Generation-aware VMEM budget (~70% of per-core capacity)."""
    cap = None
    try:
        info = pltpu.get_tpu_info()
        cap = getattr(info, "vmem_capacity_bytes", None)
    except Exception:
        cap = None
    if not cap:
        cap = 64 << 20  # conservative fallback: v7x per-TC VMEM
    return max(32 << 20, int(cap * 0.70))


def _swiglu_ffn_kernel(x_ref, w1_ref, b1_ref, w2_ref, o_ref, *acc):
    """One (M-tile, hidden-tile) grid step of the fused FFN.

    If no scratch ref is supplied (f32 output) the output block itself is the
    accumulator (its index map is constant along the reduction axis).
    """
    acc_ref = acc[0] if acc else o_ref
    k = pl.program_id(1)

    @pl.when(k == 0)
    def _():
        acc_ref[...] = jnp.zeros_like(acc_ref)

    # MXU wants narrow inputs; weights are already stored in the compute dtype,
    # the activation tile is cast here (cheap VPU op, avoids a wrapper HBM pass).
    x = x_ref[...].astype(w1_ref.dtype)                    # (tm, Dp)

    # fc1 halves for this hidden tile (packed weight: [2, Dp, th]).
    h1 = jnp.dot(x, w1_ref[0], preferred_element_type=jnp.float32)
    h1 = h1 + b1_ref[0].astype(jnp.float32)                # (tm, th)
    h2 = jnp.dot(x, w1_ref[1], preferred_element_type=jnp.float32)
    h2 = h2 + b1_ref[1].astype(jnp.float32)

    # SwiGLU (sigmoid-approx SiLU, beta=1.702) in f32 on VPU/EUP.
    s = h1 * jax.nn.sigmoid(1.702 * h1) * h2

    # Second matmul: contract this hidden tile, accumulate in f32.
    acc_ref[...] += jnp.dot(s.astype(w2_ref.dtype), w2_ref[...],
                            preferred_element_type=jnp.float32)

    if acc:  # low-precision output: cast accumulator once at the end
        @pl.when(k == pl.num_programs(1) - 1)
        def _():
            o_ref[...] = acc_ref[...].astype(o_ref.dtype)


@functools.partial(jax.jit, static_argnames=("tm", "th", "vmem_limit"))
def _swiglu_ffn_call(x, w1_packed, b1_packed, w2_t, *, tm, th, vmem_limit):
    orig_shape = x.shape
    d_model = orig_shape[-1]
    Dp = w1_packed.shape[1]
    Hp = w1_packed.shape[2]
    out_dtype = x.dtype

    x2d = x.reshape(-1, d_model)
    M = x2d.shape[0]
    Mp = _round_up(M, tm)

    # Zero-width pads / full slices compile away when shapes are tile-aligned.
    x_p = jnp.pad(x2d, ((0, Mp - M), (0, Dp - d_model)))

    grid = (Mp // tm, Hp // th)
    use_scratch = out_dtype != jnp.float32
    scratch = [pltpu.VMEM((tm, Dp), jnp.float32)] if use_scratch else []

    out = pl.pallas_call(
        _swiglu_ffn_kernel,
        out_shape=jax.ShapeDtypeStruct((Mp, Dp), out_dtype),
        grid_spec=pltpu.PrefetchScalarGridSpec(
            num_scalar_prefetch=0,
            grid=grid,
            in_specs=[
                pl.BlockSpec((tm, Dp), lambda i, k: (i, 0)),       # x tile
                pl.BlockSpec((2, Dp, th), lambda i, k: (0, 0, k)),  # packed W1^T
                pl.BlockSpec((2, 1, th), lambda i, k: (0, 0, k)),   # packed b1
                pl.BlockSpec((th, Dp), lambda i, k: (k, 0)),        # W2^T tile
            ],
            out_specs=pl.BlockSpec((tm, Dp), lambda i, k: (i, 0)),
            scratch_shapes=scratch,
        ),
        compiler_params=pltpu.CompilerParams(
            dimension_semantics=("parallel", "arbitrary"),
            vmem_limit_bytes=vmem_limit,
        ),
    )(x_p, w1_packed, b1_packed, w2_t)

    out = out[:M, :d_model]
    return out.reshape(orig_shape)


class SwiGLUFFN:
    """Pallas TPU forward of CustomPositionWiseFeedForward(d_model, d_ff, imp='custom').

    Weight preprocessing (transpose to (K, N) layout, pack the two fc1 halves,
    pad to 128-aligned shapes, cast to the compute dtype) happens exactly once
    here, so the per-call path only streams x and the prepared weights.
    """

    def __init__(self, w1, b1, w2, *, tm=256, th=256, weight_dtype=jnp.bfloat16):
        d_ff, d_model = w1.shape
        assert d_ff % 2 == 0, "d_ff must be even for SwiGLU"
        H = d_ff // 2
        assert w2.shape == (d_model, H)
        if b1 is None:
            b1 = jnp.zeros((d_ff,), w1.dtype)
        assert b1.shape == (d_ff,)

        Dp = _round_up(d_model, 128)
        th = max(128, min(_round_up(int(th), 128), _round_up(H, 128)))
        Hp = _round_up(H, th)

        # One-time relayout + pack + pad + cast (zero padding is exactly neutral:
        # padded hidden units produce s == 0 and padded W2 rows/cols are zero).
        w1a = w1[:H, :].T                                    # (d_model, H)
        w1b = w1[H:, :].T
        w1_packed = jnp.stack([w1a, w1b], axis=0)            # (2, d_model, H)
        w1_packed = jnp.pad(w1_packed, ((0, 0), (0, Dp - d_model), (0, Hp - H)))
        b1_packed = jnp.stack([b1[:H], b1[H:]], axis=0)[:, None, :]   # (2, 1, H)
        b1_packed = jnp.pad(b1_packed, ((0, 0), (0, 0), (0, Hp - H)))
        w2_t = jnp.pad(w2.T, ((0, Hp - H), (0, Dp - d_model)))        # (Hp, Dp)

        self.w1_packed = w1_packed.astype(weight_dtype)
        self.b1_packed = b1_packed.astype(weight_dtype)
        self.w2_t = w2_t.astype(weight_dtype)

        self.d_model, self.H, self.Dp, self.Hp = d_model, H, Dp, Hp
        self.tm_req, self.th = int(tm), int(th)
        self.vmem_limit = _vmem_budget_bytes()

    # --- tile selection -----------------------------------------------------
    def _estimate_vmem(self, tm, x_itemsize):
        wb = jnp.dtype(self.w1_packed.dtype).itemsize
        ob = x_itemsize
        e = 2 * tm * self.Dp * x_itemsize          # x (double-buffered)
        e += 2 * 2 * self.Dp * self.th * wb        # packed W1
        e += 2 * 2 * 8 * self.th * wb              # packed b1 (sublane-padded)
        e += 2 * self.th * self.Dp * wb            # W2
        e += 2 * tm * self.Dp * ob                 # output
        if ob != 4:
            e += tm * self.Dp * 4                  # f32 scratch accumulator
        return int(e * 1.15) + (2 << 20)           # compiler scratch margin

    def _pick_tm(self, M, x_dtype):
        tm = min(self.tm_req, _round_up(M, 128))
        tm = max(128, (tm // 128) * 128)
        xi = jnp.dtype(x_dtype).itemsize
        while self._estimate_vmem(tm, xi) > self.vmem_limit and tm > 128:
            tm = max(128, tm // 2)
        # TODO(synk): for very large d_model on v7x a third grid axis tiling the
        # output d_model (and splitting the hidden axis across the two TCs for
        # decode-sized M) would be needed; not required at these shapes.
        return tm

    # --- forward --------------------------------------------------------------
    def __call__(self, x):
        assert x.shape[-1] == self.d_model
        M = math.prod(x.shape[:-1]) if len(x.shape) > 1 else 1
        tm = self._pick_tm(max(M, 1), x.dtype)
        return _swiglu_ffn_call(x, self.w1_packed, self.b1_packed, self.w2_t,
                                tm=tm, th=self.th, vmem_limit=self.vmem_limit)


if __name__ == "__main__":
    # CustomPositionWiseFeedForward(d_model=256, d_ff=512, bias=False, imp='custom')
    batch, seq, d_model, d_ff = 2, 128, 256, 512
    H = d_ff // 2

    key = jax.random.PRNGKey(0)
    kx, k1, kb, k2 = jax.random.split(key, 4)

    x = jax.random.normal(kx, (batch, seq, d_model), dtype=jnp.float32)
    bound1 = 1.0 / math.sqrt(d_model)
    w1 = jax.random.uniform(k1, (d_ff, d_model), jnp.float32, -bound1, bound1)  # fc1.weight
    b1 = jax.random.uniform(kb, (d_ff,), jnp.float32, -bound1, bound1)          # fc1.bias
    bound2 = 1.0 / math.sqrt(H)
    w2 = jax.random.uniform(k2, (d_model, H), jnp.float32, -bound2, bound2)     # fc2.weight

    ffn = SwiGLUFFN(w1, b1, w2)        # one-time weight relayout / pack / pad / bf16
    y = ffn(x)
    jax.block_until_ready(y)

    # Plain-JAX reference of the same forward pass.
    h = x @ w1.T + b1
    h1, h2 = h[..., :H], h[..., H:]
    s = h1 * jax.nn.sigmoid(1.702 * h1) * h2
    ref = s @ w2.T

    assert y.shape == ref.shape
    max_err = float(jnp.max(jnp.abs(y - ref)))
    assert jnp.allclose(y, ref, atol=2e-2, rtol=2e-2), max_err

    print("KERNEL_OK")
</pallas_src>

<mosaic_0001>
module attributes {stable_mosaic.version = 11 : i64} {
  func.func @_swiglu_ffn_kernel(%arg0: i32, %arg1: i32, %arg2: memref<256x256xf32, #tpu.memory_space<vmem>>, %arg3: memref<2x256x256xbf16, #tpu.memory_space<vmem>>, %arg4: memref<2x1x256xbf16, #tpu.memory_space<vmem>>, %arg5: memref<256x256xbf16, #tpu.memory_space<vmem>>, %arg6: memref<256x256xf32, #tpu.memory_space<vmem>>) attributes {dimension_semantics = [#tpu.dimension_semantics<parallel>, #tpu.dimension_semantics<arbitrary>], iteration_bounds = array<i64: 1, 1>, scalar_prefetch = 0 : i64, scratch_operands = 0 : i64, tpu.core_type = #tpu.core_type<tc>, window_params = [{transform_indices = @transform_0, window_bounds = array<i64: 256, 256>}, {transform_indices = @transform_1, window_bounds = array<i64: 2, 256, 256>}, {transform_indices = @transform_2, window_bounds = array<i64: 2, 1, 256>}, {transform_indices = @transform_3, window_bounds = array<i64: 256, 256>}, {transform_indices = @transform_4, window_bounds = array<i64: 256, 256>}]} {
    %c0_i32 = arith.constant 0 : i32
    %0 = arith.cmpi eq, %arg1, %c0_i32 : i32
    %1 = arith.extui %0 : i1 to i32
    %c0_i32_0 = arith.constant 0 : i32
    %2 = arith.cmpi ne, %1, %c0_i32_0 : i32
    scf.if %2 {
      %cst_23 = arith.constant 0.000000e+00 : f32
      %36 = vector.broadcast %cst_23 : f32 to vector<256x256xf32>
      %c0_24 = arith.constant 0 : index
      %c0_25 = arith.constant 0 : index
      %37 = vector.load %arg6[%c0_24, %c0_25] : memref<256x256xf32, #tpu.memory_space<vmem>>, vector<256x256xf32>
      tpu.vector_store %arg6[%c0_24, %c0_25], %36 {strides = array<i32>} : memref<256x256xf32, #tpu.memory_space<vmem>>, vector<256x256xf32>,
    } else {
    }
    %c0 = arith.constant 0 : index
    %c0_1 = arith.constant 0 : index
    %3 = vector.load %arg2[%c0, %c0_1] : memref<256x256xf32, #tpu.memory_space<vmem>>, vector<256x256xf32>
    %4 = arith.truncf %3 : vector<256x256xf32> to vector<256x256xbf16>
    %c0_2 = arith.constant 0 : index
    %c0_3 = arith.constant 0 : index
    %c0_4 = arith.constant 0 : index
    %5 = vector.load %arg3[%c0_2, %c0_3, %c0_4] : memref<2x256x256xbf16, #tpu.memory_space<vmem>>, vector<1x256x256xbf16>
    %6 = vector.shape_cast %5 : vector<1x256x256xbf16> to vector<256x256xbf16>
    %cst = arith.constant dense<0.000000e+00> : vector<256x256xf32>
    %7 = tpu.matmul %4, %6, %cst {dimension_numbers = #tpu.dot_dimension_numbers<[1], [0], [0], [1], [0, 0, 1, 1], [], []>} : vector<256x256xbf16>, vector<256x256xbf16>, vector<256x256xf32> -> vector<256x256xf32>
    %c0_5 = arith.constant 0 : index
    %c0_6 = arith.constant 0 : index
    %c0_7 = arith.constant 0 : index
    %8 = vector.load %arg4[%c0_5, %c0_6, %c0_7] : memref<2x1x256xbf16, #tpu.memory_space<vmem>>, vector<1x1x256xbf16>
    %9 = vector.shape_cast %8 : vector<1x1x256xbf16> to vector<1x256xbf16>
    %10 = arith.extf %9 : vector<1x256xbf16> to vector<1x256xf32>
    %11 = vector.broadcast %10 : vector<1x256xf32> to vector<256x256xf32>
    %12 = arith.addf %7, %11 : vector<256x256xf32>
    %c1 = arith.constant 1 : index
    %c0_8 = arith.constant 0 : index
    %c0_9 = arith.constant 0 : index
    %13 = vector.load %arg3[%c1, %c0_8, %c0_9] : memref<2x256x256xbf16, #tpu.memory_space<vmem>>, vector<1x256x256xbf16>
    %14 = vector.shape_cast %13 : vector<1x256x256xbf16> to vector<256x256xbf16>
    %cst_10 = arith.constant dense<0.000000e+00> : vector<256x256xf32>
    %15 = tpu.matmul %4, %14, %cst_10 {dimension_numbers = #tpu.dot_dimension_numbers<[1], [0], [0], [1], [0, 0, 1, 1], [], []>} : vector<256x256xbf16>, vector<256x256xbf16>, vector<256x256xf32> -> vector<256x256xf32>
    %c1_11 = arith.constant 1 : index
    %c0_12 = arith.constant 0 : index
    %c0_13 = arith.constant 0 : index
    %16 = vector.load %arg4[%c1_11, %c0_12, %c0_13] : memref<2x1x256xbf16, #tpu.memory_space<vmem>>, vector<1x1x256xbf16>
    %17 = vector.shape_cast %16 : vector<1x1x256xbf16> to vector<1x256xbf16>
    %18 = arith.extf %17 : vector<1x256xbf16> to vector<1x256xf32>
    %19 = vector.broadcast %18 : vector<1x256xf32> to vector<256x256xf32>
    %20 = arith.addf %15, %19 : vector<256x256xf32>
    %cst_14 = arith.constant 1.702000e+00 : f32
    %21 = vector.broadcast %cst_14 : f32 to vector<256x256xf32>
    %22 = arith.mulf %21, %12 : vector<256x256xf32>
    %23 = arith.negf %22 : vector<256x256xf32>
    %24 = math.exp %23 : vector<256x256xf32>
    %cst_15 = arith.constant 1.000000e+00 : f32
    %25 = vector.broadcast %cst_15 : f32 to vector<256x256xf32>
    %26 = arith.addf %25, %24 : vector<256x256xf32>
    %27 = arith.divf %25, %26 : vector<256x256xf32>
    %28 = arith.mulf %12, %27 : vector<256x256xf32>
    %29 = arith.mulf %28, %20 : vector<256x256xf32>
    %c0_16 = arith.constant 0 : index
    %c0_17 = arith.constant 0 : index
    %30 = vector.load %arg6[%c0_16, %c0_17] : memref<256x256xf32, #tpu.memory_space<vmem>>, vector<256x256xf32>
    %31 = arith.truncf %29 : vector<256x256xf32> to vector<256x256xbf16>
    %c0_18 = arith.constant 0 : index
    %c0_19 = arith.constant 0 : index
    %32 = vector.load %arg5[%c0_18, %c0_19] : memref<256x256xbf16, #tpu.memory_space<vmem>>, vector<256x256xbf16>
    %cst_20 = arith.constant dense<0.000000e+00> : vector<256x256xf32>
    %33 = tpu.matmul %31, %32, %cst_20 {dimension_numbers = #tpu.dot_dimension_numbers<[1], [0], [0], [1], [0, 0, 1, 1], [], []>} : vector<256x256xbf16>, vector<256x256xbf16>, vector<256x256xf32> -> vector<256x256xf32>
    %34 = arith.addf %30, %33 : vector<256x256xf32>
    %c0_21 = arith.constant 0 : index
    %c0_22 = arith.constant 0 : index
    %35 = vector.load %arg6[%c0_21, %c0_22] : memref<256x256xf32, #tpu.memory_space<vmem>>, vector<256x256xf32>
    tpu.vector_store %arg6[%c0_21, %c0_22], %34 {strides = array<i32>} : memref<256x256xf32, #tpu.memory_space<vmem>>, vector<256x256xf32>,
    return
  }
  func.func @transform_0(%arg0: i32, %arg1: i32) -> (i32, i32) {
    %c0_i32 = arith.constant 0 : i32
    %c0_i32_0 = arith.constant 0 : i32
    return %arg0, %c0_i32 : i32, i32
  }
  func.func @transform_1(%arg0: i32, %arg1: i32) -> (i32, i32, i32) {
    %c0_i32 = arith.constant 0 : i32
    %c0_i32_0 = arith.constant 0 : i32
    %c0_i32_1 = arith.constant 0 : i32
    return %c0_i32, %c0_i32_0, %arg1 : i32, i32, i32
  }
  func.func @transform_2(%arg0: i32, %arg1: i32) -> (i32, i32, i32) {
    %c0_i32 = arith.constant 0 : i32
    %c0_i32_0 = arith.constant 0 : i32
    %c0_i32_1 = arith.constant 0 : i32
    return %c0_i32, %c0_i32_0, %arg1 : i32, i32, i32
  }
  func.func @transform_3(%arg0: i32, %arg1: i32) -> (i32, i32) {
    %c0_i32 = arith.constant 0 : i32
    %c0_i32_0 = arith.constant 0 : i32
    return %arg1, %c0_i32 : i32, i32
  }
  func.func @transform_4(%arg0: i32, %arg1: i32) -> (i32, i32) {
    %c0_i32 = arith.constant 0 : i32
    %c0_i32_0 = arith.constant 0 : i32
    return %arg0, %c0_i32 : i32, i32
  }
}

</mosaic_0001>

<bundles_post_ra>
// kernel: _swiglu_ffn_call.1
= control target key start
LH: loop header
LB: loop body
LE: loop exit
PB: predicated region body
PF: predicated region fallthrough
CT: control target
= control target key end

     0   :  { %9 = vsyncpa [#allocation3], 0  ;;  %s4144_s0 = inlined_call_operand.hbm [shape: f32[256,256], index: 0, kind: input, shape index: {}]   ;;  %s4145_s1 = inlined_call_operand.hbm [shape: bf16[2,256,256], index: 1, kind: input, shape index: {}]   ;;  %s4146_s2 = inlined_call_operand.vmem [shape: bf16[2,1,256], index: 2, kind: input, shape index: {}]   ;;  %s4147_s3 = inlined_call_operand.hbm [shape: bf16[256,256], index: 3, kind: input, shape index: {}]   ;;  %s4148_s4 = inlined_call_operand.hbm [shape: f32[256,256], index: 4, kind: output, shape index: {}]  }
   0x1   :  { %10 = vsyncpa [#allocation6], 0 }
   0x2   :  { %11 = vsyncpa [#allocation4], 0  ;;  %s2936_s15 = smov [#allocation5]   ;;  %s2842_s19 = scalar_lea.hbm %s4145_s1, 8192 }
   0x3   :  { %s29_s16 = sshll.u32 %s2936_s15, 4  ;;  %p2843_p0 = scmp.ne.s32.totalorder %s4145_s1, %s2842_s19  ;;  %s30_s16 = int_to_ptr.vmem [resolvable:$true] %s29_s16 }
   0x4   :  { %p2846_p1 = scmp.lt.u32.totalorder %s2842_s19, %s4145_s1 }
   0x6   :  { %p2848_p2 = pnand %p2846_p1, %p2843_p0 }
   0x8   :  { %2851 = shalt.err (!%p2848_p2)
}
   0x9   :  { %s2852_s24 = scalar_lea.vmem %s30_s16, 8192  ;;  %p2857_p4 = scmp.lt.s32.totalorder %s30_s16, %s30_s16 }
   0xa   :  { %p2853_p3 = scmp.ne.s32.totalorder %s30_s16, %s2852_s24  ;;  %p2858_p5 = scmp.lt.s32.totalorder %s2852_s24, %s2852_s24 }
   0xc   :  { %p2859_p6 = por %p2858_p5, %p2857_p4 }
   0xe   :  { %p2860_p7 = pnand %p2859_p6, %p2853_p3 }
  0x10   :  { %2863 = shalt.err (!%p2860_p7)
}
  0x11   :  { %s2937_s25 = smov 128   ;;  %s2938_s26 = smov 8  }
  0x12   :  { %35 = dma.hbm_to_vmem [thread:$0]  %s4145_s1, 8192, %s30_s16, [#allocation6], %s2937_s25, %s2937_s25, %s2938_s26  }
  0x13   :  { %s2939_s29 = smov [#allocation2]   ;;  %s2864_s7 = scalar_lea.hbm %s4144_s0, 8192 }
  0x14   :  { %s17_s30 = sshll.u32 %s2939_s29, 4  ;;  %p2865_p8 = scmp.ne.s32.totalorder %s4144_s0, %s2864_s7  ;;  %s18_s30 = int_to_ptr.vmem [resolvable:$true] %s17_s30 }
  0x15   :  { %p2868_p9 = scmp.lt.u32.totalorder %s2864_s7, %s4144_s0 }
  0x17   :  { %p2870_p10 = pnand %p2868_p9, %p2865_p8 }
  0x19   :  { %2873 = shalt.err (!%p2870_p10)
}
  0x1a   :  { %s2874_s12 = scalar_lea.vmem %s18_s30, 8192  ;;  %p2879_p12 = scmp.lt.s32.totalorder %s18_s30, %s18_s30 }
  0x1b   :  { %p2875_p11 = scmp.ne.s32.totalorder %s18_s30, %s2874_s12  ;;  %p2880_p13 = scmp.lt.s32.totalorder %s2874_s12, %s2874_s12 }
  0x1d   :  { %p2881_p0 = por %p2880_p13, %p2879_p12 }
  0x1f   :  { %p2882_p1 = pnand %p2881_p0, %p2875_p11 }
  0x21   :  { %2885 = shalt.err (!%p2882_p1)
}
  0x22   :  { %s2940_s1 = smov 256   ;;  %s2941_s13 = smov 16  }
  0x23   :  { %23 = dma.hbm_to_vmem [thread:$0]  %s4144_s0, 8192, %s18_s30, [#allocation3], %s2940_s1, %s2940_s1, %s2941_s13  }
  0x24   :  { %s2942_s16 = smov [#allocation7]   ;;  %s2886_s20 = scalar_lea.hbm %s4147_s3, 4096 }
  0x25   :  { %s43_s17 = sshll.u32 %s2942_s16, 4  ;;  %p2887_p2 = scmp.ne.s32.totalorder %s4147_s3, %s2886_s20  ;;  %s44_s17 = int_to_ptr.vmem [resolvable:$true] %s43_s17 }
  0x26   :  { %p2890_p3 = scmp.lt.u32.totalorder %s2886_s20, %s4147_s3 }
  0x28   :  { %p2892_p4 = pnand %p2890_p3, %p2887_p2 }
  0x2a   :  { %2895 = shalt.err (!%p2892_p4)
}
  0x2b   :  { %s2896_s27 = scalar_lea.vmem %s44_s17, 4096  ;;  %p2901_p6 = scmp.lt.s32.totalorder %s44_s17, %s44_s17 }
  0x2c   :  { %p2897_p5 = scmp.ne.s32.totalorder %s44_s17, %s2896_s27  ;;  %p2902_p7 = scmp.lt.s32.totalorder %s2896_s27, %s2896_s27 }
  0x2e   :  { %p2903_p8 = por %p2902_p7, %p2901_p6 }
  0x30   :  { %p2904_p9 = pnand %p2903_p8, %p2897_p5 }
  0x32   :  { %2907 = shalt.err (!%p2904_p9)
}
  0x33   :  { %49 = dma.hbm_to_vmem [thread:$0]  %s4147_s3, 4096, %s44_s17, [#allocation6], %s2937_s25, %s2937_s25, %s2938_s26  }
  0x34   :  { %2930 = dma.done.wait [#allocation3], 8192  }
  0x35   :  { %2931 = vsyncadd [#allocation3], 4294959104 }
  0x36   :  { %2932 = dma.done.wait [#allocation6], 12288  }
  0x37   :  { %2933 = vsyncadd [#allocation6], 4294955008  ;;  %v2442_v0 = vld [vmem:[#allocation5 + $0x4] ss:$8 sps:$4 sm:$0xff]   ;;  %v2444_v1 = vld [vmem:[#allocation5] ss:$8 sps:$4 sm:$0xff]  }
  0x38   :  { %2401 = vmatprep.subr.bf16.mxu1 %v2442_v0  ;;  %436 = vmatprep.subr.bf16.mxu0 %v2442_v0  ;;  %v2445_v2 = vld [vmem:[#allocation5 + $0x14] ss:$8 sps:$4 sm:$0xff]   ;;  %v2447_v3 = vld [vmem:[#allocation5 + $0x10] ss:$8 sps:$4 sm:$0xff]   ;;  %v2448_v4 = vld [vmem:[#allocation5 + $0x24] ss:$8 sps:$4 sm:$0xff]  }
  0x39   :  { %2417 = vmatpush1.bf16.msra.mxu1 %v2444_v1  ;;  %437 = vmatpush1.bf16.msra.mxu0 %v2444_v1  ;;  %v2450_v5 = vld [vmem:[#allocation5 + $0x20] ss:$8 sps:$4 sm:$0xff]   ;;  %v2451_v6 = vld [vmem:[#allocation5 + $0x34] ss:$8 sps:$4 sm:$0xff]   ;;  %v2453_v7 = vld [vmem:[#allocation5 + $0x30] ss:$8 sps:$4 sm:$0xff]  }
  0x3a   :  { %2402 = vmatprep.subr.bf16.mxu1 %v2445_v2  ;;  %438 = vmatprep.subr.bf16.mxu0 %v2445_v2  ;;  %v2454_v8 = vld [vmem:[#allocation5 + $0x44] ss:$8 sps:$4 sm:$0xff]   ;;  %v2456_v9 = vld [vmem:[#allocation5 + $0x40] ss:$8 sps:$4 sm:$0xff]   ;;  %v2457_v10 = vld [vmem:[#allocation5 + $0x54] ss:$8 sps:$4 sm:$0xff]  }
  0x3b   :  { %v2459_v11 = vld [vmem:[#allocation5 + $0x50] ss:$8 sps:$4 sm:$0xff]   ;;  %v2460_v12 = vld [vmem:[#allocation5 + $0x64] ss:$8 sps:$4 sm:$0xff]   ;;  %v2462_v16 = vld [vmem:[#allocation5 + $0x60] ss:$8 sps:$4 sm:$0xff]  }
  0x3c   :  { %v160_v13 = vld [vmem:[#allocation2 + $0x108] sm:$0xff]  ;;  %v162_v14 = vld [vmem:[#allocation2 + $0x118] sm:$0xff]  ;;  %v159_v38 = vld [vmem:[#allocation2 + $0x100] sm:$0xff] }
  0x3d   :  { %2418 = vmatpush1.bf16.msra.mxu1 %v2447_v3  ;;  %439 = vmatpush1.bf16.msra.mxu0 %v2447_v3  ;;  %v3014_v15 = vpack.c.bf16 %v162_v14, %v160_v13  ;;  %v2463_v17 = vld [vmem:[#allocation5 + $0x74] ss:$8 sps:$4 sm:$0xff]   ;;  %v128_v18 = vld [vmem:[#allocation2 + $0x8] sm:$0xff]  ;;  %v2465_v21 = vld [vmem:[#allocation5 + $0x70] ss:$8 sps:$4 sm:$0xff]  }
  0x3e   :  { %2403 = vmatprep.subr.bf16.mxu1 %v2448_v4  ;;  %440 = vmatprep.subr.bf16.mxu0 %v2448_v4  ;;  %v130_v19 = vld [vmem:[#allocation2 + $0x18] sm:$0xff]  ;;  %v2466_v22 = vld [vmem:[#allocation5 + $0x84] ss:$8 sps:$4 sm:$0xff]   ;;  %v2468_v23 = vld [vmem:[#allocation5 + $0x80] ss:$8 sps:$4 sm:$0xff]  }
  0x3f   :  { %548 = vmatprep.mubr.bf16.mxu1 %v3014_v15  ;;  %v3017_v20 = vpack.c.bf16 %v130_v19, %v128_v18  ;;  %v2469_v24 = vld [vmem:[#allocation5 + $0x94] ss:$8 sps:$4 sm:$0xff]   ;;  %v2471_v25 = vld [vmem:[#allocation5 + $0x90] ss:$8 sps:$4 sm:$0xff]   ;;  %v2472_v26 = vld [vmem:[#allocation5 + $0xa4] ss:$8 sps:$4 sm:$0xff]  }
  0x40   :  { %v2474_v27 = vld [vmem:[#allocation5 + $0xa0] ss:$8 sps:$4 sm:$0xff]   ;;  %v2475_v28 = vld [vmem:[#allocation5 + $0xb4] ss:$8 sps:$4 sm:$0xff]   ;;  %v2477_v29 = vld [vmem:[#allocation5 + $0xb0] ss:$8 sps:$4 sm:$0xff]  }
  0x41   :  { %2419 = vmatpush1.bf16.msra.mxu1 %v2450_v5  ;;  %441 = vmatpush1.bf16.msra.mxu0 %v2450_v5  ;;  %v2478_v30 = vld [vmem:[#allocation5 + $0xc4] ss:$8 sps:$4 sm:$0xff]   ;;  %v2480_v31 = vld [vmem:[#allocation5 + $0xc0] ss:$8 sps:$4 sm:$0xff]   ;;  %v2481_v32 = vld [vmem:[#allocation5 + $0xd4] ss:$8 sps:$4 sm:$0xff]  }
  0x42   :  { %2404 = vmatprep.subr.bf16.mxu1 %v2451_v6  ;;  %442 = vmatprep.subr.bf16.mxu0 %v2451_v6  ;;  %v2483_v33 = vld [vmem:[#allocation5 + $0xd0] ss:$8 sps:$4 sm:$0xff]   ;;  %v2484_v34 = vld [vmem:[#allocation5 + $0xe4] ss:$8 sps:$4 sm:$0xff]   ;;  %v2486_v35 = vld [vmem:[#allocation5 + $0xe0] ss:$8 sps:$4 sm:$0xff]  }
  0x43   :  { %468 = vmatprep.mubr.bf16.mxu0 %v3017_v20  ;;  %v2487_v36 = vld [vmem:[#allocation5 + $0xf4] ss:$8 sps:$4 sm:$0xff]   ;;  %v2489_v37 = vld [vmem:[#allocation5 + $0xf0] ss:$8 sps:$4 sm:$0xff]   ;;  %v2492_v40 = vld [vmem:[#allocation5 + $0x104] ss:$8 sps:$4 sm:$0xff]  }
  0x44   :  { %v161_v39 = vld [vmem:[#allocation2 + $0x110] sm:$0xff]  ;;  %v127_v41 = vld [vmem:[#allocation2] sm:$0xff]  ;;  %v164_v43 = vld [vmem:[#allocation2 + $0x128] sm:$0xff] }
  0x45   :  { %2420 = vmatpush1.bf16.msra.mxu1 %v2453_v7  ;;  %443 = vmatpush1.bf16.msra.mxu0 %v2453_v7  ;;  %v129_v42 = vld [vmem:[#allocation2 + $0x10] sm:$0xff]  ;;  %v166_v44 = vld [vmem:[#allocation2 + $0x138] sm:$0xff]  ;;  %v132_v45 = vld [vmem:[#allocation2 + $0x28] sm:$0xff]  ;;  %v3020_v47 = vpack.c.bf16 %v161_v39, %v159_v38 }
  0x46   :  { %2405 = vmatprep.subr.bf16.mxu1 %v2454_v8  ;;  %444 = vmatprep.subr.bf16.mxu0 %v2454_v8  ;;  %v134_v46 = vld [vmem:[#allocation2 + $0x38] sm:$0xff]  ;;  %v3022_v48 = vpack.c.bf16 %v129_v42, %v127_v41  ;;  %v2490_v49 = vld [vmem:[#allocation5 + $0x100] ss:$8 sps:$4 sm:$0xff]   ;;  %v3024_v51 = vpack.c.bf16 %v166_v44, %v164_v43  ;;  %v165_v55 = vld [vmem:[#allocation2 + $0x130] sm:$0xff] }
  0x47   :  { %v2495_v50 = vld [vmem:[#allocation5 + $0x114] ss:$8 sps:$4 sm:$0xff]   ;;  %v3026_v52 = vpack.c.bf16 %v134_v46, %v132_v45  ;;  %v2493_v53 = vld [vmem:[#allocation5 + $0x110] ss:$8 sps:$4 sm:$0xff]   ;;  %v163_v54 = vld [vmem:[#allocation2 + $0x120] sm:$0xff] }
  0x48   :  { %v131_v56 = vld [vmem:[#allocation2 + $0x20] sm:$0xff]  ;;  %v133_v57 = vld [vmem:[#allocation2 + $0x30] sm:$0xff]  ;;  %v168_v59 = vld [vmem:[#allocation2 + $0x148] sm:$0xff]  ;;  %v3032_v0 = vpack.c.bf16 %v165_v55, %v163_v54 }
  0x49   :  { %2421 = vmatpush1.bf16.msra.mxu1 %v2456_v9  ;;  %445 = vmatpush1.bf16.msra.mxu0 %v2456_v9  ;;  %v2498_v58 = vld [vmem:[#allocation5 + $0x124] ss:$8 sps:$4 sm:$0xff]   ;;  %v170_v60 = vld [vmem:[#allocation2 + $0x158] sm:$0xff]  ;;  %v2496_v63 = vld [vmem:[#allocation5 + $0x120] ss:$8 sps:$4 sm:$0xff]   ;;  %v3034_v1 = vpack.c.bf16 %v133_v57, %v131_v56 }
  0x4a   :  { %2406 = vmatprep.subr.bf16.mxu1 %v2457_v10  ;;  %446 = vmatprep.subr.bf16.mxu0 %v2457_v10  ;;  %v136_v61 = vld [vmem:[#allocation2 + $0x48] sm:$0xff]  ;;  %v138_v62 = vld [vmem:[#allocation2 + $0x58] sm:$0xff]  ;;  %v3036_v3 = vpack.c.bf16 %v170_v60, %v168_v59  ;;  %v167_v6 = vld [vmem:[#allocation2 + $0x140] sm:$0xff] }
  0x4b   :  { %v2501_v2 = vld [vmem:[#allocation5 + $0x134] ss:$8 sps:$4 sm:$0xff]   ;;  %v3038_v4 = vpack.c.bf16 %v138_v62, %v136_v61  ;;  %v2499_v5 = vld [vmem:[#allocation5 + $0x130] ss:$8 sps:$4 sm:$0xff]   ;;  %v135_v8 = vld [vmem:[#allocation2 + $0x40] sm:$0xff] }
  0x4c   :  { %v169_v7 = vld [vmem:[#allocation2 + $0x150] sm:$0xff]  ;;  %v2504_v10 = vld [vmem:[#allocation5 + $0x144] ss:$8 sps:$4 sm:$0xff]   ;;  %v142_v14 = vld [vmem:[#allocation2 + $0x78] sm:$0xff] }
  0x4d   :  { %2422 = vmatpush1.bf16.msra.mxu1 %v2459_v11  ;;  %447 = vmatpush1.bf16.msra.mxu0 %v2459_v11  ;;  %v137_v9 = vld [vmem:[#allocation2 + $0x50] sm:$0xff]  ;;  %v172_v11 = vld [vmem:[#allocation2 + $0x168] sm:$0xff]  ;;  %v143_v42 = vld [vmem:[#allocation2 + $0x80] sm:$0xff] }
  0x4e   :  { %2407 = vmatprep.subr.bf16.mxu1 %v2460_v12  ;;  %448 = vmatprep.subr.bf16.mxu0 %v2460_v12  ;;  %v174_v12 = vld [vmem:[#allocation2 + $0x178] sm:$0xff]  ;;  %v140_v13 = vld [vmem:[#allocation2 + $0x68] sm:$0xff]  ;;  %v177_v41 = vld [vmem:[#allocation2 + $0x190] sm:$0xff] }
  0x4f   :  { %v2502_v18 = vld [vmem:[#allocation5 + $0x140] ss:$8 sps:$4 sm:$0xff]   ;;  %v3048_v19 = vpack.c.bf16 %v174_v12, %v172_v11  ;;  %v2511_v39 = vld [vmem:[#allocation5 + $0x170] ss:$8 sps:$4 sm:$0xff]   ;;  %v2516_v44 = vld [vmem:[#allocation5 + $0x184] ss:$8 sps:$4 sm:$0xff]  }
  0x50   :  { %v145_v43 = vld [vmem:[#allocation2 + $0x90] sm:$0xff]  ;;  %v180_v45 = vld [vmem:[#allocation2 + $0x1a8] sm:$0xff]  ;;  %v182_v46 = vld [vmem:[#allocation2 + $0x1b8] sm:$0xff] }
  0x51   :  { %2423 = vmatpush1.bf16.msra.mxu1 %v2462_v16  ;;  %449 = vmatpush1.bf16.msra.mxu0 %v2462_v16  ;;  %v3044_v16 = vpack.c.bf16 %v169_v7, %v167_v6  ;;  %v3070_v54 = vpack.c.bf16 %v145_v43, %v143_v42  ;;  %v2514_v55 = vld [vmem:[#allocation5 + $0x180] ss:$8 sps:$4 sm:$0xff]   ;;  %v3072_v56 = vpack.c.bf16 %v182_v46, %v180_v45  ;;  %v2519_v57 = vld [vmem:[#allocation5 + $0x194] ss:$8 sps:$4 sm:$0xff]   ;;  %v2517_v59 = vld [vmem:[#allocation5 + $0x190] ss:$8 sps:$4 sm:$0xff]  }
  0x52   :  { %2408 = vmatprep.subr.bf16.mxu1 %v2463_v17  ;;  %450 = vmatprep.subr.bf16.mxu0 %v2463_v17  ;;  %v3046_v17 = vpack.c.bf16 %v137_v9, %v135_v8  ;;  %v179_v60 = vld [vmem:[#allocation2 + $0x1a0] sm:$0xff]  ;;  %v181_v61 = vld [vmem:[#allocation2 + $0x1b0] sm:$0xff]  ;;  %v186_v6 = vld [vmem:[#allocation2 + $0x1d8] sm:$0xff] }
  0x53   :  { %v147_v62 = vld [vmem:[#allocation2 + $0xa0] sm:$0xff]  ;;  %v152_v7 = vld [vmem:[#allocation2 + $0xc8] sm:$0xff]  ;;  %v154_v8 = vld [vmem:[#allocation2 + $0xd8] sm:$0xff]  ;;  %v3080_v9 = vpack.c.bf16 %v181_v61, %v179_v60 }
  0x54   :  { %v2520_v11 = vld [vmem:[#allocation5 + $0x1a0] ss:$8 sps:$4 sm:$0xff]   ;;  %v189_v43 = vld [vmem:[#allocation2 + $0x1f0] sm:$0xff]  ;;  %v2534_v46 = vld [vmem:[#allocation5 + $0x1e4] ss:$8 sps:$4 sm:$0xff]  }
  0x55   :  { %2424 = vmatpush1.bf16.msra.mxu1 %v2465_v21  ;;  %451 = vmatpush1.bf16.msra.mxu0 %v2465_v21  ;;  %v2507_v21 = vld [vmem:[#allocation5 + $0x154] ss:$8 sps:$4 sm:$0xff]   ;;  %v187_v42 = vld [vmem:[#allocation2 + $0x1e0] sm:$0xff] }
  0x56   :  { %2409 = vmatprep.subr.bf16.mxu1 %v2466_v22  ;;  %452 = vmatprep.subr.bf16.mxu0 %v2466_v22  ;;  %v3050_v22 = vpack.c.bf16 %v142_v14, %v140_v13  ;;  %v2525_v13 = vld [vmem:[#allocation5 + $0x1b4] ss:$8 sps:$4 sm:$0xff]   ;;  %v3086_v14 = vpack.c.bf16 %v154_v8, %v152_v7  ;;  %v2540_v60 = vld [vmem:[#allocation7 + $0x4] ss:$8 sps:$4 sm:$0xff]   ;;  %v255_v8 = vld [vmem:[%s4146_s2] sm:$0x3] }
  0x57   :  { %v157_v45 = vld [vmem:[#allocation2 + $0xf0] sm:$0xff]  ;;  %v2558_v61 = vld [vmem:[#allocation7 + $0x64] ss:$8 sps:$4 sm:$0xff]  }
  0x59   :  { %2425 = vmatpush1.bf16.msra.mxu1 %v2468_v23  ;;  %453 = vmatpush1.bf16.msra.mxu0 %v2468_v23  ;;  %v2505_v23 = vld [vmem:[#allocation5 + $0x150] ss:$8 sps:$4 sm:$0xff]  }
  0x5a   :  { %2410 = vmatprep.subr.bf16.mxu1 %v2469_v24  ;;  %454 = vmatprep.subr.bf16.mxu0 %v2469_v24  ;;  %v171_v24 = vld [vmem:[#allocation2 + $0x160] sm:$0xff] }
  0x5d   :  { %2426 = vmatpush1.bf16.msra.mxu1 %v2471_v25  ;;  %455 = vmatpush1.bf16.msra.mxu0 %v2471_v25  ;;  %v173_v25 = vld [vmem:[#allocation2 + $0x170] sm:$0xff] }
  0x5e   :  { %2411 = vmatprep.subr.bf16.mxu1 %v2472_v26  ;;  %456 = vmatprep.subr.bf16.mxu0 %v2472_v26  ;;  %v139_v26 = vld [vmem:[#allocation2 + $0x60] sm:$0xff] }
  0x61   :  { %2427 = vmatpush1.bf16.msra.mxu1 %v2474_v27  ;;  %457 = vmatpush1.bf16.msra.mxu0 %v2474_v27  ;;  %v141_v27 = vld [vmem:[#allocation2 + $0x70] sm:$0xff] }
  0x62   :  { %2412 = vmatprep.subr.bf16.mxu1 %v2475_v28  ;;  %458 = vmatprep.subr.bf16.mxu0 %v2475_v28  ;;  %v2510_v28 = vld [vmem:[#allocation5 + $0x164] ss:$8 sps:$4 sm:$0xff]  }
  0x65   :  { %2428 = vmatpush1.bf16.msra.mxu1 %v2477_v29  ;;  %459 = vmatpush1.bf16.msra.mxu0 %v2477_v29  ;;  %v176_v29 = vld [vmem:[#allocation2 + $0x188] sm:$0xff] }
  0x66   :  { %2413 = vmatprep.subr.bf16.mxu1 %v2478_v30  ;;  %460 = vmatprep.subr.bf16.mxu0 %v2478_v30  ;;  %v178_v30 = vld [vmem:[#allocation2 + $0x198] sm:$0xff] }
  0x69   :  { %2429 = vmatpush1.bf16.msra.mxu1 %v2480_v31  ;;  %461 = vmatpush1.bf16.msra.mxu0 %v2480_v31  ;;  %v144_v31 = vld [vmem:[#allocation2 + $0x88] sm:$0xff] }
  0x6a   :  { %2414 = vmatprep.subr.bf16.mxu1 %v2481_v32  ;;  %462 = vmatprep.subr.bf16.mxu0 %v2481_v32  ;;  %v146_v32 = vld [vmem:[#allocation2 + $0x98] sm:$0xff] }
  0x6b   :  { %v3062_v38 = vpack.c.bf16 %v146_v32, %v144_v31 }
  0x6d   :  { %2430 = vmatpush1.bf16.msra.mxu1 %v2483_v33  ;;  %463 = vmatpush1.bf16.msra.mxu0 %v2483_v33  ;;  %v3056_v33 = vpack.c.bf16 %v173_v25, %v171_v24  ;;  %v151_v24 = vld [vmem:[#allocation2 + $0xc0] sm:$0xff]  ;;  %v153_v25 = vld [vmem:[#allocation2 + $0xd0] sm:$0xff] }
  0x6e   :  { %2415 = vmatprep.subr.bf16.mxu1 %v2484_v34  ;;  %464 = vmatprep.subr.bf16.mxu0 %v2484_v34  ;;  %v3058_v34 = vpack.c.bf16 %v141_v27, %v139_v26  ;;  %v2528_v26 = vld [vmem:[#allocation5 + $0x1c4] ss:$8 sps:$4 sm:$0xff]   ;;  %v203_v32 = vpack.c.bf16 %v153_v25, %v151_v24 }
  0x6f   :  { %v188_v27 = vld [vmem:[#allocation2 + $0x1e8] sm:$0xff] }
  0x71   :  { %2431 = vmatpush1.bf16.msra.mxu1 %v2486_v35  ;;  %465 = vmatpush1.bf16.msra.mxu0 %v2486_v35  ;;  %v2508_v35 = vld [vmem:[#allocation5 + $0x160] ss:$8 sps:$4 sm:$0xff]  }
  0x72   :  { %2416 = vmatprep.subr.bf16.mxu1 %v2487_v36  ;;  %466 = vmatprep.subr.bf16.mxu0 %v2487_v36  ;;  %v3060_v36 = vpack.c.bf16 %v178_v30, %v176_v29  ;;  %v156_v29 = vld [vmem:[#allocation2 + $0xe8] sm:$0xff]  ;;  %v158_v30 = vld [vmem:[#allocation2 + $0xf8] sm:$0xff] }
  0x75   :  { %2432 = vmatpush1.bf16.msra.mxu1 %v2489_v37  ;;  %467 = vmatpush1.bf16.msra.mxu0 %v2489_v37  ;;  %v2513_v37 = vld [vmem:[#allocation5 + $0x174] ss:$8 sps:$4 sm:$0xff]  }
  0x76   :  { %844 = vmatprep.subr.bf16.mxu1 %v2492_v40  ;;  %v175_v40 = vld [vmem:[#allocation2 + $0x180] sm:$0xff]  ;;  %1901 = vmatprep.subr.bf16.mxu0 %v2540_v60 }
  0x78   :  { %549 = vmatmul.mubr.bf16.vlgmr.msra.gmra.mrb[0].mxu1 %v3020_v47  ;;  %469 = vmatmul.mubr.bf16.vlgmr.msra.gmra.mrb[0].mxu0 %v3022_v48 }
  0x79   :  { %845 = vmatpush1.bf16.msra.mxu1 %v2490_v49  ;;  %558 = vmatprep.mubr.bf16.mxu1 %v3024_v51  ;;  %v148_v49 = vld [vmem:[#allocation2 + $0xa8] sm:$0xff] }
  0x7a   :  { %846 = vmatprep.subr.bf16.mxu1 %v2495_v50  ;;  %478 = vmatprep.mubr.bf16.mxu0 %v3026_v52  ;;  %v150_v50 = vld [vmem:[#allocation2 + $0xb8] sm:$0xff] }
  0x7d   :  { %847 = vmatpush1.bf16.msra.mxu1 %v2493_v53  ;;  %v3068_v53 = vpack.c.bf16 %v177_v41, %v175_v40  ;;  %v206_v40 = vpack.c.bf16 %v158_v30, %v156_v29  ;;  %v2529_v41 = vld [vmem:[#allocation5 + $0x1d0] ss:$8 sps:$4 sm:$0xff]  }
  0x7e   :  { %848 = vmatprep.subr.bf16.mxu1 %v2498_v58  ;;  %v3074_v58 = vpack.c.bf16 %v150_v50, %v148_v49  ;;  %v3098_v49 = vpack.c.bf16 %v189_v43, %v187_v42 }
  0x80   :  { %559 = vmatmul.mubr.bf16.gmra.mrb[4].mxu1 %v3032_v0  ;;  %479 = vmatmul.mubr.bf16.gmra.mrb[4].mxu0 %v3034_v1 }
  0x81   :  { %849 = vmatpush1.bf16.msra.mxu1 %v2496_v63  ;;  %568 = vmatprep.mubr.bf16.mxu1 %v3036_v3  ;;  %v149_v63 = vld [vmem:[#allocation2 + $0xb0] sm:$0xff] }
  0x82   :  { %850 = vmatprep.subr.bf16.mxu1 %v2501_v2  ;;  %488 = vmatprep.mubr.bf16.mxu0 %v3038_v4  ;;  %v2522_v2 = vld [vmem:[#allocation5 + $0x1a4] ss:$8 sps:$4 sm:$0xff]  }
  0x85   :  { %851 = vmatpush1.bf16.msra.mxu1 %v2499_v5  ;;  %v184_v5 = vld [vmem:[#allocation2 + $0x1c8] sm:$0xff] }
  0x86   :  { %852 = vmatprep.subr.bf16.mxu1 %v2504_v10  ;;  %v3082_v10 = vpack.c.bf16 %v149_v63, %v147_v62  ;;  %v3084_v12 = vpack.c.bf16 %v186_v6, %v184_v5  ;;  %v2576_v62 = vld [vmem:[#allocation7 + $0xc4] ss:$8 sps:$4 sm:$0xff]   ;;  %v2574_v63 = vld [vmem:[#allocation7 + $0xc0] ss:$8 sps:$4 sm:$0xff]   ;;  %v2579_v5 = vld [vmem:[#allocation7 + $0xd4] ss:$8 sps:$4 sm:$0xff]  }
  0x87   :  { %v2577_v6 = vld [vmem:[#allocation7 + $0xd0] ss:$8 sps:$4 sm:$0xff]  }
  0x88   :  { %569 = vmatmul.mubr.bf16.gmra.mrb[8].mxu1 %v3044_v16  ;;  %489 = vmatmul.mubr.bf16.gmra.mrb[8].mxu0 %v3046_v17 }
  0x89   :  { %853 = vmatpush1.bf16.msra.mxu1 %v2502_v18  ;;  %578 = vmatprep.mubr.bf16.mxu1 %v3048_v19  ;;  %v2523_v18 = vld [vmem:[#allocation5 + $0x1b0] ss:$8 sps:$4 sm:$0xff]  }
  0x8a   :  { %854 = vmatprep.subr.bf16.mxu1 %v2507_v21  ;;  %498 = vmatprep.mubr.bf16.mxu0 %v3050_v22  ;;  %v183_v21 = vld [vmem:[#allocation2 + $0x1c0] sm:$0xff] }
  0x8d   :  { %855 = vmatpush1.bf16.msra.mxu1 %v2505_v23  ;;  %v185_v23 = vld [vmem:[#allocation2 + $0x1d0] sm:$0xff] }
  0x8e   :  { %856 = vmatprep.subr.bf16.mxu1 %v2510_v28  ;;  %v190_v28 = vld [vmem:[#allocation2 + $0x1f8] sm:$0xff]  ;;  %v3092_v31 = vpack.c.bf16 %v185_v23, %v183_v21 }
  0x90   :  { %579 = vmatmul.mubr.bf16.gmra.mrb[12].mxu1 %v3056_v33  ;;  %499 = vmatmul.mubr.bf16.gmra.mrb[12].mxu0 %v3058_v34 }
  0x91   :  { %857 = vmatpush1.bf16.msra.mxu1 %v2508_v35  ;;  %588 = vmatprep.mubr.bf16.mxu1 %v3060_v36  ;;  %v2526_v35 = vld [vmem:[#allocation5 + $0x1c0] ss:$8 sps:$4 sm:$0xff]  }
  0x92   :  { %858 = vmatprep.subr.bf16.mxu1 %v2513_v37  ;;  %508 = vmatprep.mubr.bf16.mxu0 %v3062_v38  ;;  %v3094_v37 = vpack.c.bf16 %v190_v28, %v188_v27 }
  0x95   :  { %859 = vmatpush1.bf16.msra.mxu1 %v2511_v39  ;;  %v2531_v39 = vld [vmem:[#allocation5 + $0x1d4] ss:$8 sps:$4 sm:$0xff]  }
  0x96   :  { %860 = vmatprep.subr.bf16.mxu1 %v2516_v44  ;;  %v155_v44 = vld [vmem:[#allocation2 + $0xe0] sm:$0xff] }
  0x97   :  { %v205_v50 = vpack.c.bf16 %v157_v45, %v155_v44 }
  0x98   :  { %589 = vmatmul.mubr.bf16.gmra.mrb[16].mxu1 %v3068_v53  ;;  %509 = vmatmul.mubr.bf16.gmra.mrb[16].mxu0 %v3070_v54 }
  0x99   :  { %861 = vmatpush1.bf16.msra.mxu1 %v2514_v55  ;;  %598 = vmatprep.mubr.bf16.mxu1 %v3072_v56  ;;  %v2532_v55 = vld [vmem:[#allocation5 + $0x1e0] ss:$8 sps:$4 sm:$0xff]  }
  0x9a   :  { %862 = vmatprep.subr.bf16.mxu1 %v2519_v57  ;;  %518 = vmatprep.mubr.bf16.mxu0 %v3074_v58  ;;  %v2537_v57 = vld [vmem:[#allocation5 + $0x1f4] ss:$8 sps:$4 sm:$0xff]  }
  0x9d   :  { %863 = vmatpush1.bf16.msra.mxu1 %v2517_v59  ;;  %v2535_v59 = vld [vmem:[#allocation5 + $0x1f0] ss:$8 sps:$4 sm:$0xff]  }
  0x9e   :  { %864 = vmatprep.subr.bf16.mxu1 %v2522_v2  ;;  %v258_v2 = vlaneseq }
  0xa0   :  { %599 = vmatmul.mubr.bf16.gmra.mrb[20].mxu1 %v3080_v9  ;;  %519 = vmatmul.mubr.bf16.gmra.mrb[20].mxu0 %v3082_v10  ;;  %v3130_v7 = vshrl.u32 %v258_v2, 7 }
  0xa1   :  { %865 = vmatpush1.bf16.msra.mxu1 %v2520_v11  ;;  %608 = vmatprep.mubr.bf16.mxu1 %v3084_v12  ;;  %v256_v11 = vunpack.c.l.bf16 %v255_v8 }
  0xa2   :  { %866 = vmatprep.subr.bf16.mxu1 %v2525_v13  ;;  %528 = vmatprep.mubr.bf16.mxu0 %v3086_v14  ;;  %v4149_v13 = vsub.s32 2, %v3130_v7 }
  0xa4   :  { %v265_v23 = vrot.slane %v256_v11, %v4149_v13 }
  0xa5   :  { %867 = vmatpush1.bf16.msra.mxu1 %v2523_v18  ;;  %v2583_v18 = vld [vmem:[#allocation7 + $0xf0] ss:$8 sps:$4 sm:$0xff]  }
  0xa6   :  { %868 = vmatprep.subr.bf16.mxu1 %v2528_v26 }
  0xa8   :  { %609 = vmatmul.mubr.bf16.gmra.mrb[24].mxu1 %v3092_v31  ;;  %529 = vmatmul.mubr.bf16.gmra.mrb[24].mxu0 %v203_v32 }
  0xa9   :  { %869 = vmatpush1.bf16.msra.mxu1 %v2526_v35  ;;  %618 = vmatprep.mubr.bf16.mxu1 %v3094_v37 }
  0xaa   :  { %870 = vmatprep.subr.bf16.mxu1 %v2531_v39  ;;  %538 = vmatprep.mubr.bf16.mxu0 %v206_v40 }
  0xad   :  { %871 = vmatpush1.bf16.msra.mxu1 %v2529_v41 }
  0xae   :  { %872 = vmatprep.subr.bf16.mxu1 %v2534_v46 }
  0xb0   :  { %619 = vmatmul.mubr.bf16.gmra.mrb[28].mxu1 %v3098_v49  ;;  %539 = vmatmul.mubr.bf16.gmra.mrb[28].mxu0 %v205_v50 }
  0xb1   :  { %873 = vmatpush1.bf16.msra.mxu1 %v2532_v55  ;;  %876 = vmatprep.mubr.bf16.mxu1 %v3017_v20  ;;  %v2538_v20 = vld [vmem:[#allocation7] ss:$8 sps:$4 sm:$0xff]  }
  0xb2   :  { %874 = vmatprep.subr.bf16.mxu1 %v2537_v57  ;;  %1902 = vmatpush1.bf16.msra.mxu0 %v2538_v20 }
  0xb5   :  { %875 = vmatpush1.bf16.msra.mxu1 %v2535_v59 }
  0xb8   :  { %877 = vmatmul.mubr.bf16.vlgmr.msra.gmra.mrb[32].mxu1 %v3022_v48  ;;  %v2543_v48 = vld [vmem:[#allocation7 + $0x14] ss:$8 sps:$4 sm:$0xff]  }
  0xb9   :  { %886 = vmatprep.mubr.bf16.mxu1 %v3026_v52  ;;  %v2541_v52 = vld [vmem:[#allocation7 + $0x10] ss:$8 sps:$4 sm:$0xff]   ;;  %1903 = vmatprep.subr.bf16.mxu0 %v2543_v48 }
  0xba   :  { %1904 = vmatpush1.bf16.msra.mxu0 %v2541_v52 }
  0xc0   :  { %887 = vmatmul.mubr.bf16.gmra.mrb[36].mxu1 %v3034_v1  ;;  %v2546_v1 = vld [vmem:[#allocation7 + $0x24] ss:$8 sps:$4 sm:$0xff]  }
  0xc1   :  { %896 = vmatprep.mubr.bf16.mxu1 %v3038_v4  ;;  %v2544_v4 = vld [vmem:[#allocation7 + $0x20] ss:$8 sps:$4 sm:$0xff]   ;;  %1905 = vmatprep.subr.bf16.mxu0 %v2546_v1 }
  0xc2   :  { %1906 = vmatpush1.bf16.msra.mxu0 %v2544_v4 }
  0xc8   :  { %897 = vmatmul.mubr.bf16.gmra.mrb[40].mxu1 %v3046_v17  ;;  %v2549_v17 = vld [vmem:[#allocation7 + $0x34] ss:$8 sps:$4 sm:$0xff]  }
  0xc9   :  { %906 = vmatprep.mubr.bf16.mxu1 %v3050_v22  ;;  %v2547_v22 = vld [vmem:[#allocation7 + $0x30] ss:$8 sps:$4 sm:$0xff]   ;;  %1907 = vmatprep.subr.bf16.mxu0 %v2549_v17 }
  0xca   :  { %1908 = vmatpush1.bf16.msra.mxu0 %v2547_v22 }
  0xd0   :  { %907 = vmatmul.mubr.bf16.gmra.mrb[44].mxu1 %v3058_v34  ;;  %v2552_v34 = vld [vmem:[#allocation7 + $0x44] ss:$8 sps:$4 sm:$0xff]  }
  0xd1   :  { %916 = vmatprep.mubr.bf16.mxu1 %v3062_v38  ;;  %v2550_v38 = vld [vmem:[#allocation7 + $0x40] ss:$8 sps:$4 sm:$0xff]   ;;  %1909 = vmatprep.subr.bf16.mxu0 %v2552_v34 }
  0xd2   :  { %1910 = vmatpush1.bf16.msra.mxu0 %v2550_v38 }
  0xd8   :  { %917 = vmatmul.mubr.bf16.gmra.mrb[48].mxu1 %v3070_v54  ;;  %v2555_v54 = vld [vmem:[#allocation7 + $0x54] ss:$8 sps:$4 sm:$0xff]  }
  0xd9   :  { %926 = vmatprep.mubr.bf16.mxu1 %v3074_v58  ;;  %v2553_v58 = vld [vmem:[#allocation7 + $0x50] ss:$8 sps:$4 sm:$0xff]   ;;  %1911 = vmatprep.subr.bf16.mxu0 %v2555_v54 }
  0xda   :  { %1912 = vmatpush1.bf16.msra.mxu0 %v2553_v58 }
  0xdb   :  { %1913 = vmatprep.subr.bf16.mxu0 %v2558_v61 }
  0xe0   :  { %927 = vmatmul.mubr.bf16.gmra.mrb[52].mxu1 %v3082_v10  ;;  %v2580_v10 = vld [vmem:[#allocation7 + $0xe0] ss:$8 sps:$4 sm:$0xff]  }
  0xe1   :  { %936 = vmatprep.mubr.bf16.mxu1 %v3086_v14  ;;  %v2585_v14 = vld [vmem:[#allocation7 + $0xf4] ss:$8 sps:$4 sm:$0xff]  }
  0xe8   :  { %937 = vmatmul.mubr.bf16.gmra.mrb[56].mxu1 %v203_v32 }
  0xe9   :  { %946 = vmatprep.mubr.bf16.mxu1 %v206_v40 }
  0xf0   :  { %947 = vmatmul.mubr.bf16.gmra.mrb[60].mxu1 %v205_v50 }
  0xf1   :  { %956 = vmatprep.mubr.bf16.mxu1 %v3014_v15  ;;  %v2556_v15 = vld [vmem:[#allocation7 + $0x60] ss:$8 sps:$4 sm:$0xff]  }
  0xf2   :  { %1914 = vmatpush1.bf16.msra.mxu0 %v2556_v15 }
  0xf8   :  { %957 = vmatmul.mubr.bf16.gmra.mrb[64].mxu1 %v3020_v47  ;;  %v2561_v47 = vld [vmem:[#allocation7 + $0x74] ss:$8 sps:$4 sm:$0xff]  }
  0xf9   :  { %966 = vmatprep.mubr.bf16.mxu1 %v3024_v51  ;;  %v2559_v51 = vld [vmem:[#allocation7 + $0x70] ss:$8 sps:$4 sm:$0xff]   ;;  %1915 = vmatprep.subr.bf16.mxu0 %v2561_v47 }
  0xfa   :  { %1916 = vmatpush1.bf16.msra.mxu0 %v2559_v51 }
 0x100   :  { %967 = vmatmul.mubr.bf16.gmra.mrb[68].mxu1 %v3032_v0  ;;  %v2564_v0 = vld [vmem:[#allocation7 + $0x84] ss:$8 sps:$4 sm:$0xff]  }
 0x101   :  { %976 = vmatprep.mubr.bf16.mxu1 %v3036_v3  ;;  %v2562_v3 = vld [vmem:[#allocation7 + $0x80] ss:$8 sps:$4 sm:$0xff]   ;;  %1917 = vmatprep.subr.bf16.mxu0 %v2564_v0 }
 0x102   :  { %1918 = vmatpush1.bf16.msra.mxu0 %v2562_v3 }
 0x108   :  { %977 = vmatmul.mubr.bf16.gmra.mrb[72].mxu1 %v3044_v16  ;;  %v2567_v16 = vld [vmem:[#allocation7 + $0x94] ss:$8 sps:$4 sm:$0xff]  }
 0x109   :  { %986 = vmatprep.mubr.bf16.mxu1 %v3048_v19  ;;  %v2565_v19 = vld [vmem:[#allocation7 + $0x90] ss:$8 sps:$4 sm:$0xff]   ;;  %1919 = vmatprep.subr.bf16.mxu0 %v2567_v16 }
 0x10a   :  { %1920 = vmatpush1.bf16.msra.mxu0 %v2565_v19 }
 0x110   :  { %987 = vmatmul.mubr.bf16.gmra.mrb[76].mxu1 %v3056_v33  ;;  %v2570_v33 = vld [vmem:[#allocation7 + $0xa4] ss:$8 sps:$4 sm:$0xff]  }
 0x111   :  { %996 = vmatprep.mubr.bf16.mxu1 %v3060_v36  ;;  %v2568_v36 = vld [vmem:[#allocation7 + $0xa0] ss:$8 sps:$4 sm:$0xff]   ;;  %1921 = vmatprep.subr.bf16.mxu0 %v2570_v33 }
 0x112   :  { %1922 = vmatpush1.bf16.msra.mxu0 %v2568_v36 }
 0x118   :  { %997 = vmatmul.mubr.bf16.gmra.mrb[80].mxu1 %v3068_v53  ;;  %v2573_v53 = vld [vmem:[#allocation7 + $0xb4] ss:$8 sps:$4 sm:$0xff]  }
 0x119   :  { %1006 = vmatprep.mubr.bf16.mxu1 %v3072_v56  ;;  %v2571_v56 = vld [vmem:[#allocation7 + $0xb0] ss:$8 sps:$4 sm:$0xff]   ;;  %1923 = vmatprep.subr.bf16.mxu0 %v2573_v53 }
 0x11a   :  { %1924 = vmatpush1.bf16.msra.mxu0 %v2571_v56 }
 0x11b   :  { %1925 = vmatprep.subr.bf16.mxu0 %v2576_v62 }
 0x11e   :  { %1926 = vmatpush1.bf16.msra.mxu0 %v2574_v63 }
 0x11f   :  { %1927 = vmatprep.subr.bf16.mxu0 %v2579_v5 }
 0x120   :  { %1007 = vmatmul.mubr.bf16.gmra.mrb[84].mxu1 %v3080_v9  ;;  %v2582_v9 = vld [vmem:[#allocation7 + $0xe4] ss:$8 sps:$4 sm:$0xff]  }
 0x121   :  { %1016 = vmatprep.mubr.bf16.mxu1 %v3084_v12  ;;  %v3136_v12 = vsub.s32 0, %v3130_v7 }
 0x122   :  { %1928 = vmatpush1.bf16.msra.mxu0 %v2577_v6 }
 0x123   :  { %1929 = vmatprep.subr.bf16.mxu0 %v2582_v9  ;;  %v261_v21 = vrot.slane %v256_v11, %v3136_v12  ;;  %v3146_v29 = vrot.slane %v265_v23, %v3136_v12 }
 0x125   :  { %v3143_v26 = vrot.slane %v261_v21, %v3136_v12 }
 0x126   :  { %1930 = vmatpush1.bf16.msra.mxu0 %v2580_v10 }
 0x127   :  { %1931 = vmatprep.subr.bf16.mxu0 %v2585_v14 }
 0x128   :  { %1017 = vmatmul.mubr.bf16.gmra.mrb[88].mxu1 %v3092_v31 }
 0x129   :  { %1026 = vmatprep.mubr.bf16.mxu1 %v3094_v37 }
 0x12a   :  { %1932 = vmatpush1.bf16.msra.mxu0 %v2583_v18 }
 0x130   :  { %1027 = vmatmul.mubr.bf16.gmra.mrb[92].mxu1 %v3098_v49 }
 0x14b   :  { %v550_v24 = vpop.f32.mrb[0].mxu1  ;;  %v470_v25 = vpop.f32.mrb[0].mxu0 }
 0x14c   :  { %v552_v27 = vpop.f32.mrb[1].mxu1  ;;  %v472_v28 = vpop.f32.mrb[1].mxu0  ;;  %v3149_v37 = vadd.f32 %v550_v24, %v3143_v26  ;;  %v3162_v45 = vadd.f32 %v470_v25, %v3143_v26 }
 0x14d   :  { %v554_v30 = vpop.f32.mrb[2].mxu1  ;;  %v474_v31 = vpop.f32.mrb[2].mxu0  ;;  %v3152_v39 = vadd.f32 %v552_v27, %v3146_v29  ;;  %v3168_v55 = vadd.f32 %v472_v28, %v3146_v29 }
 0x14e   :  { %v556_v32 = vpop.f32.mrb[3].mxu1  ;;  %v476_v35 = vpop.f32.mrb[3].mxu0  ;;  %v3155_v40 = vadd.f32 %v554_v30, %v3143_v26  ;;  %v2337_v44 = vmul.f32 -1.702, %v3149_v37  ;;  %v3174_v20 = vadd.f32 %v474_v31, %v3143_v26  ;;  %v2305_v22 = vmul.f32 -1.702, %v3162_v45 }
 0x14f   :  { %v3158_v41 = vadd.f32 %v556_v32, %v3146_v29  ;;  %v2338_v50 = vmul.f32 -1.702, %v3152_v39  ;;  %v3180_v4 = vadd.f32 %v476_v35, %v3146_v29  ;;  %v2306_v54 = vmul.f32 -1.702, %v3168_v55 }
 0x150   :  { %v2339_v60 = vmul.f32 -1.702, %v3155_v40  ;;  %v1229_v17 = vmul.f32 1.442695, %v2337_v44  ;;  %v2307_v15 = vmul.f32 -1.702, %v3174_v20 }
 0x151   :  { %v2340_v1 = vmul.f32 -1.702, %v3158_v41  ;;  %v1231_v38 = vmul.f32 1.442695, %v2338_v50  ;;  %v2308_v51 = vmul.f32 -1.702, %v3180_v4 }
 0x152   :  { %v1233_v61 = vmul.f32 1.442695, %v2339_v60  ;;  %2586 = vpow2.f32 %v1229_v17  ;;  %v1165_v16 = vmul.f32 1.442695, %v2305_v22  ;;  %v1167_v53 = vmul.f32 1.442695, %v2306_v54 }
 0x153   :  { %v560_v42 = vpop.f32.mrb[4].mxu1  ;;  %v480_v43 = vpop.f32.mrb[4].mxu0  ;;  %v1235_v47 = vmul.f32 1.442695, %v2340_v1  ;;  %2588 = vpow2.f32 %v1231_v38  ;;  %v1169_v2 = vmul.f32 1.442695, %v2307_v15 }
 0x154   :  { %v562_v46 = vpop.f32.mrb[5].mxu1  ;;  %v3164_v49 = vpop.f32.mrb[5].mxu0  ;;  %v3184_v34 = vadd.f32 %v560_v42, %v3143_v26  ;;  %2590 = vpow2.f32 %v1233_v61  ;;  %v1171_v9 = vmul.f32 1.442695, %v2308_v51  ;;  %v3217_v14 = vadd.f32 %v480_v43, %v3143_v26 }
 0x155   :  { %v564_v57 = vpop.f32.mrb[6].mxu1  ;;  %v3170_v59 = vpop.f32.mrb[6].mxu0  ;;  %v3188_v58 = vadd.f32 %v562_v46, %v3146_v29  ;;  %2592 = vpow2.f32 %v1235_v47  ;;  %v3240_v61 = vadd.f32 %v3164_v49, %v3146_v29 }
 0x156   :  { %v566_v48 = vpop.f32.mrb[7].mxu1  ;;  %v3176_v52 = vpop.f32.mrb[7].mxu0  ;;  %v2341_v19 = vmul.f32 -1.702, %v3184_v34  ;;  %v3207_v5 = vadd.f32 %v564_v57, %v3143_v26  ;;  %2594 = vpow2.f32 %v1165_v16  ;;  %v2309_v27 = vmul.f32 -1.702, %v3217_v14 }
 0x157   :  { %v2342_v56 = vmul.f32 -1.702, %v3188_v58  ;;  %v3214_v10 = vadd.f32 %v566_v48, %v3146_v29  ;;  %2596 = vpow2.f32 %v1167_v53  ;;  %4178 = vst [vmem:[#allocation12_spill] sm:$0xff] %v3240_v61  ;;  %v3256_v49 = vadd.f32 %v3176_v52, %v3146_v29 }
 0x158   :  { %v1237_v11 = vmul.f32 1.442695, %v2341_v19  ;;  %2598 = vpow2.f32 %v1169_v2  ;;  %v2343_v21 = vmul.f32 -1.702, %v3207_v5  ;;  %v1173_v60 = vmul.f32 1.442695, %v2309_v27 }
 0x159   :  { %v1239_v18 = vmul.f32 1.442695, %v2342_v56  ;;  %2600 = vpow2.f32 %v1171_v9  ;;  %v2344_v23 = vmul.f32 -1.702, %v3214_v10  ;;  %v3248_v19 = vadd.f32 %v3170_v59, %v3143_v26  ;;  %4180 = vst [vmem:[#allocation14_spill] sm:$0xff] %v3256_v49 }
 0x15a   :  { %2602 = vpow2.f32 %v1237_v11  ;;  %v1241_v35 = vmul.f32 1.442695, %v2343_v21  ;;  %v2310_v52 = vmul.f32 -1.702, %v3240_v61 }
 0x15b   :  { %v3192_v0 = vpop.f32.mrb[8].mxu1  ;;  %v3194_v3 = vpop.f32.mrb[8].mxu0  ;;  %2604 = vpow2.f32 %v1239_v18  ;;  %v1243_v46 = vmul.f32 1.442695, %v2344_v23  ;;  %4179 = vst [vmem:[#allocation13_spill] sm:$0xff] %v3248_v19 }
 0x15c   :  { %v3197_v33 = vpop.f32.mrb[9].mxu1  ;;  %v3199_v36 = vpop.f32.mrb[9].mxu0  ;;  %2606 = vpow2.f32 %v1241_v35  ;;  %v3264_v59 = vadd.f32 %v3192_v0, %v3143_v26 }
 0x15d   :  { %v3202_v62 = vpop.f32.mrb[10].mxu1  ;;  %v3204_v63 = vpop.f32.mrb[10].mxu0  ;;  %2608 = vpow2.f32 %v1243_v46  ;;  %v3273_v46 = vadd.f32 %v3197_v33, %v3146_v29 }
 0x15e   :  { %v3209_v6 = vpop.f32.mrb[11].mxu1  ;;  %v3211_v8 = vpop.f32.mrb[11].mxu0  ;;  %2610 = vpow2.f32 %v1173_v60  ;;  %4181 = vst [vmem:[#allocation15_spill] sm:$0xff] %v3264_v59  ;;  %v2311_v60 = vmul.f32 -1.702, %v3248_v19  ;;  %v3278_v0 = vadd.f32 %v3202_v62, %v3143_v26 }
 0x15f   :  { %v2587_v32 = vpop.eup %2586  ;;  %4182 = vst [vmem:[#allocation16_spill] sm:$0xff] %v3273_v46  ;;  %v2345_v33 = vmul.f32 -1.702, %v3264_v59  ;;  %v2346_v62 = vmul.f32 -1.702, %v3273_v46 }
 0x160   :  { %v2589_v44 = vpop.eup %2588  ;;  %v1325_v1 = vadd.f32 1.0, %v2587_v32  ;;  %4183 = vst [vmem:[#allocation17_spill] sm:$0xff] %v3278_v0 }
 0x161   :  { %v2591_v57 = vpop.eup %2590  ;;  %v1326_v22 = vadd.f32 1.0, %v2589_v44  ;;  %v1245_v59 = vmul.f32 1.442695, %v2345_v33  ;;  %v1247_v19 = vmul.f32 1.442695, %v2346_v62  ;;  %v3323_v33 = vadd.f32 %v3211_v8, %v3146_v29 }
 0x162   :  { %v2593_v48 = vpop.eup %2592  ;;  %v1327_v54 = vadd.f32 1.0, %v2591_v57  ;;  %2612 = vrcp.f32 %v1325_v1  ;;  %v2312_v1 = vmul.f32 -1.702, %v3256_v49 }
 0x163   :  { %v3221_v24 = vpop.f32.mrb[12].mxu1  ;;  %v3223_v25 = vpop.f32.mrb[12].mxu0  ;;  %v1328_v16 = vadd.f32 1.0, %v2593_v48  ;;  %2614 = vrcp.f32 %v1326_v22  ;;  %4192 = vst [vmem:[#allocation26_spill] sm:$0xff] %v3323_v33 }
 0x164   :  { %v3226_v28 = vpop.f32.mrb[13].mxu1  ;;  %v3228_v30 = vpop.f32.mrb[13].mxu0  ;;  %2616 = vrcp.f32 %v1327_v54  ;;  %v1175_v54 = vmul.f32 1.442695, %v2310_v52 }
 0x165   :  { %v3230_v31 = vpop.f32.mrb[14].mxu1  ;;  %v3234_v43 = vpop.f32.mrb[14].mxu0  ;;  %2618 = vrcp.f32 %v1328_v16  ;;  %v3338_v8 = vadd.f32 %v3226_v28, %v3146_v29 }
 0x166   :  { %v3232_v42 = vpop.f32.mrb[15].mxu1  ;;  %v3236_v50 = vpop.f32.mrb[15].mxu0 }
 0x167   :  { %v2595_v17 = vpop.eup %2594  ;;  %4194 = vst [vmem:[#allocation28_spill] sm:$0xff] %v3338_v8 }
 0x168   :  { %v2597_v38 = vpop.eup %2596  ;;  %v1293_v9 = vadd.f32 1.0, %v2595_v17  ;;  %v3283_v17 = vadd.f32 %v3209_v6, %v3146_v29 }
 0x169   :  { %v2599_v51 = vpop.eup %2598  ;;  %v1294_v23 = vadd.f32 1.0, %v2597_v38  ;;  %v3288_v38 = vadd.f32 %v3194_v3, %v3143_v26 }
 0x16a   :  { %v2601_v2 = vpop.eup %2600  ;;  %v1295_v44 = vadd.f32 1.0, %v2599_v51  ;;  %2620 = vrcp.f32 %v1293_v9  ;;  %4184 = vst [vmem:[#allocation18_spill] sm:$0xff] %v3283_v17  ;;  %v3293_v51 = vadd.f32 %v3199_v36, %v3146_v29  ;;  %v1177_v9 = vmul.f32 1.442695, %v2311_v60 }
 0x16b   :  { %v3242_v15 = vpop.f32.mrb[16].mxu1  ;;  %v3244_v47 = vpop.f32.mrb[16].mxu0  ;;  %v1296_v57 = vadd.f32 1.0, %v2601_v2  ;;  %2622 = vrcp.f32 %v1294_v23  ;;  %4185 = vst [vmem:[#allocation19_spill] sm:$0xff] %v3288_v38  ;;  %v2348_v52 = vmul.f32 -1.702, %v3283_v17 }
 0x16c   :  { %v3250_v53 = vpop.f32.mrb[17].mxu1  ;;  %v3252_v56 = vpop.f32.mrb[17].mxu0  ;;  %2624 = vrcp.f32 %v1295_v44  ;;  %4186 = vst [vmem:[#allocation20_spill] sm:$0xff] %v3293_v51  ;;  %v1179_v44 = vmul.f32 1.442695, %v2312_v1  ;;  %v3317_v1 = vadd.f32 %v3204_v63, %v3143_v26  ;;  %v3332_v63 = vadd.f32 %v3221_v24, %v3143_v26 }
 0x16d   :  { %v3258_v11 = vpop.f32.mrb[18].mxu1  ;;  %v3260_v18 = vpop.f32.mrb[18].mxu0  ;;  %2626 = vrcp.f32 %v1296_v57  ;;  %v2313_v57 = vmul.f32 -1.702, %v3288_v38  ;;  %v2272_v38 = vld [vmem:[%s4146_s2 + $0x2] sm:$0x3] }
 0x16e   :  { %v2603_v21 = vpop.eup %2602  ;;  %v3266_v27 = vpop.f32.mrb[19].mxu1  ;;  %4191 = vst [vmem:[#allocation25_spill] sm:$0xff] %v3317_v1  ;;  %v1251_v62 = vmul.f32 1.442695, %v2348_v52  ;;  %4193 = vst [vmem:[#allocation27_spill] sm:$0xff] %v3332_v63  ;;  %v664_v24 = vunpack.c.l.bf16 %v2272_v38  ;;  %s2943_s2 = smov [#allocation8]  }
 0x16f   :  { %v3268_v32 = vpop.f32.mrb[19].mxu0  ;;  %v2605_v35 = vpop.eup %2604  ;;  %v1329_v48 = vadd.f32 1.0, %v2603_v21  ;;  %v2347_v21 = vmul.f32 -1.702, %v3278_v0  ;;  %v2315_v61 = vmul.f32 -1.702, %v3317_v1 }
 0x170   :  { %v1330_v22 = vadd.f32 1.0, %v2605_v35  ;;  %v2607_v2 = vpop.eup %2606  ;;  %s2227_s30 = sshll.u32 %s2943_s2, 4  ;;  %s2228_s30 = int_to_ptr.vmem [resolvable:$true] %s2227_s30 }
 0x171   :  { %v2609_v35 = vpop.eup %2608  ;;  %2628 = vrcp.f32 %v1329_v48  ;;  %v2314_v48 = vmul.f32 -1.702, %v3293_v51  ;;  %s2908_s5 = scalar_lea.vmem %s2228_s30, 8192  ;;  %p2913_p11 = scmp.lt.s32.totalorder %s2228_s30, %s2228_s30 }
 0x172   :  { %v2611_v46 = vpop.eup %2610  ;;  %2630 = vrcp.f32 %v1330_v22  ;;  %v1249_v22 = vmul.f32 1.442695, %v2347_v21  ;;  %p2909_p10 = scmp.ne.s32.totalorder %s2228_s30, %s2908_s5  ;;  %p2914_p12 = scmp.lt.s32.totalorder %s2908_s5, %s2908_s5 }
 0x173   :  { %v3295_v16 = vpop.f32.mrb[20].mxu1  ;;  %v3297_v6 = vpop.f32.mrb[20].mxu0  ;;  %2632 = vpow2.f32 %v1175_v54  ;;  %v1297_v38 = vadd.f32 1.0, %v2611_v46 }
 0x174   :  { %v3300_v23 = vpop.f32.mrb[21].mxu1  ;;  %v3302_v3 = vpop.f32.mrb[21].mxu0  ;;  %2634 = vpow2.f32 %v1177_v9  ;;  %v1181_v9 = vmul.f32 1.442695, %v2313_v57  ;;  %p2915_p13 = por %p2914_p12, %p2913_p11 }
 0x175   :  { %4187 = vst [vmem:[#allocation21_spill] sm:$0xff] %v3302_v3  ;;  %v3305_v36 = vpop.f32.mrb[22].mxu1  ;;  %v3307_v13 = vpop.f32.mrb[22].mxu0  ;;  %2636 = vpow2.f32 %v1179_v44 }
 0x176   :  { %4188 = vst [vmem:[#allocation22_spill] sm:$0xff] %v3307_v13  ;;  %v3310_v60 = vpop.f32.mrb[23].mxu1  ;;  %v3312_v0 = vpop.f32.mrb[23].mxu0  ;;  %2638 = vpow2.f32 %v1245_v59  ;;  %v1331_v13 = vadd.f32 1.0, %v2607_v2  ;;  %v2316_v59 = vmul.f32 -1.702, %v3323_v33  ;;  %p2916_p0 = pnand %p2915_p13, %p2909_p10 }
 0x177   :  { %4189 = vst [vmem:[#allocation23_spill] sm:$0xff] %v3310_v60  ;;  %4190 = vst [vmem:[#allocation24_spill] sm:$0xff] %v3312_v0  ;;  %v2613_v49 = vpop.eup %2612  ;;  %2640 = vpow2.f32 %v1247_v19  ;;  %v1183_v60 = vmul.f32 1.442695, %v2314_v48  ;;  %v1332_v19 = vadd.f32 1.0, %v2609_v35 }
 0x178   :  { %v3319_v17 = vpop.eup %2614  ;;  %2642 = vpow2.f32 %v1249_v22  ;;  %v2349_v48 = vmul.f32 -1.702, %v3332_v63  ;;  %v2350_v2 = vmul.f32 -1.702, %v3338_v8  ;;  %v4202_v63 = vsub.s32 2, %v3130_v7 }
 0x179   :  { %v3328_v54 = vpop.eup %2616  ;;  %2644 = vpow2.f32 %v1251_v62  ;;  %v669_v62 = vrot.slane %v664_v24, %v3136_v12  ;;  %v1187_v46 = vmul.f32 1.442695, %v2316_v59 }
 0x17a   :  { %v3334_v51 = vpop.eup %2618  ;;  %2646 = vpow2.f32 %v1181_v9  ;;  %v3377_v9 = vadd.f32 %v3230_v31, %v3143_v26 }
 0x17b   :  { %v3340_v21 = vpop.eup %2620  ;;  %v3343_v44 = vpop.f32.mrb[24].mxu1  ;;  %2648 = vpow2.f32 %v1183_v60  ;;  %v3389_v31 = vrot.slane %v669_v62, %v3136_v12 }
 0x17c   :  { %4195 = vst [vmem:[#allocation29_spill] sm:$0xff] %v3343_v44  ;;  %v3345_v52 = vpop.f32.mrb[24].mxu0  ;;  %v3347_v0 = vpop.eup %2622  ;;  %2650 = vrcp.f32 %v1331_v13  ;;  %4203 = vst [vmem:[#allocation36_spill] sm:$0xff] %v3377_v9 }
 0x17d   :  { %4196 = vst [vmem:[#allocation30_spill] sm:$0xff] %v3345_v52  ;;  %v3350_v57 = vpop.f32.mrb[25].mxu1  ;;  %v3352_v28 = vpop.f32.mrb[25].mxu0  ;;  %2652 = vrcp.f32 %v1332_v19 }
 0x17e   :  { %4197 = vst [vmem:[#allocation31_spill] sm:$0xff] %v3350_v57  ;;  %4198 = vst [vmem:[#allocation32_spill] sm:$0xff] %v3352_v28  ;;  %v3354_v3 = vpop.eup %2624  ;;  %v3357_v44 = vpop.f32.mrb[26].mxu1  ;;  %v1185_v28 = vmul.f32 1.442695, %v2315_v61  ;;  %2654 = vrcp.f32 %v1297_v38  ;;  %v3405_v38 = vmul.f32 %v3319_v17, %v3152_v39 }
 0x17f   :  { %4199 = vst [vmem:[#allocation33_spill] sm:$0xff] %v3357_v44  ;;  %v3359_v1 = vpop.eup %2626  ;;  %v3362_v22 = vpop.f32.mrb[27].mxu1  ;;  %v673_v44 = vrot.slane %v664_v24, %v4202_v63  ;;  %v1255_v61 = vmul.f32 1.442695, %v2350_v2  ;;  %v3384_v63 = vmul.f32 %v2613_v49, %v3149_v37 }
 0x180   :  { %4200 = vst [vmem:[#allocation34_spill] sm:$0xff] %v3362_v22  ;;  %v3364_v33 = vpop.f32.mrb[26].mxu0  ;;  %v3366_v57 = vpop.eup %2628  ;;  %v1253_v22 = vmul.f32 1.442695, %v2349_v48  ;;  %2656 = vpow2.f32 %v1185_v28  ;;  %v2351_v48 = vmul.f32 -1.702, %v3377_v9  ;;  %v3418_v9 = vadd.f32 %v3228_v30, %v3146_v29 }
 0x181   :  { %v3368_v35 = vpop.f32.mrb[27].mxu0  ;;  %v3373_v52 = vpop.eup %2630  ;;  %4205 = vst [vmem:[#allocation38_spill] sm:$0xff] %v3384_v63  ;;  %v3392_v24 = vrot.slane %v673_v44, %v3136_v12  ;;  %2658 = vpow2.f32 %v1187_v46  ;;  %4208 = vst [vmem:[#allocation41_spill] sm:$0xff] %v3405_v38  ;;  %v3409_v12 = vmul.f32 %v3328_v54, %v3155_v40  ;;  %v3426_v54 = vmul.f32 %v3334_v51, %v3158_v41 }
 0x182   :  { %4201 = vst [vmem:[#allocation35_spill] sm:$0xff] %v3368_v35  ;;  %v2633_v8 = vpop.eup %2632  ;;  %v3381_v35 = vadd.f32 %v3232_v42, %v3146_v29  ;;  %v3397_v42 = vadd.f32 %v3223_v25, %v3143_v26  ;;  %2660 = vpow2.f32 %v1253_v22  ;;  %v3430_v22 = vmul.f32 %v3340_v21, %v3162_v45 }
 0x183   :  { %v2635_v60 = vpop.eup %2634  ;;  %v3386_v13 = vpop.f32.mrb[28].mxu1  ;;  %v1298_v19 = vadd.f32 1.0, %v2633_v8  ;;  %4209 = vst [vmem:[#allocation42_spill] sm:$0xff] %v3409_v12  ;;  %2662 = vpow2.f32 %v1255_v61  ;;  %4212 = vst [vmem:[#allocation45_spill] sm:$0xff] %v3426_v54  ;;  %v3434_v61 = vadd.f32 %v3234_v43, %v3143_v26  ;;  %v3443_v51 = vmul.f32 %v3347_v0, %v3168_v55 }
 0x184   :  { %4204 = vst [vmem:[#allocation37_spill] sm:$0xff] %v3381_v35  ;;  %v2637_v7 = vpop.eup %2636  ;;  %4206 = vst [vmem:[#allocation39_spill] sm:$0xff] %v3386_v13  ;;  %v3399_v37 = vpop.f32.mrb[29].mxu1  ;;  %v1299_v8 = vadd.f32 1.0, %v2635_v60  ;;  %v2352_v46 = vmul.f32 -1.702, %v3381_v35  ;;  %v3447_v45 = vmul.f32 %v3354_v3, %v3174_v20  ;;  %v3454_v54 = vmul.f32 %v3359_v1, %v3180_v4 }
 0x185   :  { %v2639_v59 = vpop.eup %2638  ;;  %4207 = vst [vmem:[#allocation40_spill] sm:$0xff] %v3399_v37  ;;  %v3401_v49 = vpop.f32.mrb[28].mxu0  ;;  %v1300_v62 = vadd.f32 1.0, %v2637_v7  ;;  %2664 = vrcp.f32 %v1298_v19  ;;  %v2319_v0 = vmul.f32 -1.702, %v3434_v61  ;;  %v3467_v4 = vmul.f32 %v3366_v57, %v3184_v34 }
 0x186   :  { %v2641_v28 = vpop.eup %2640  ;;  %v3411_v44 = vpop.f32.mrb[30].mxu1  ;;  %v1333_v60 = vadd.f32 1.0, %v2639_v59  ;;  %2666 = vrcp.f32 %v1299_v8  ;;  %v3449_v19 = vmul.f32 1.442695, %v2352_v46  ;;  %v3471_v1 = vmul.f32 %v3373_v52, %v3188_v58 }
 0x187   :  { %4210 = vst [vmem:[#allocation43_spill] sm:$0xff] %v3411_v44  ;;  %v3413_v2 = vpop.f32.mrb[29].mxu0  ;;  %v2643_v25 = vpop.eup %2642  ;;  %v1334_v35 = vadd.f32 1.0, %v2641_v28  ;;  %v2317_v44 = vmul.f32 -1.702, %v3397_v42  ;;  %2668 = vrcp.f32 %v1300_v62  ;;  %v3461_v62 = vadd.f32 %v3236_v50, %v3146_v29  ;;  %4213 = vst [vmem:[#allocation46_spill] sm:$0xff] %v3467_v4 }
 0x188   :  { %v3420_v39 = vpop.f32.mrb[31].mxu1  ;;  %v3422_v17 = vpop.f32.mrb[30].mxu0  ;;  %v1335_v43 = vadd.f32 1.0, %v2643_v25  ;;  %2670 = vrcp.f32 %v1333_v60  ;;  %4214 = vst [vmem:[#allocation47_spill] sm:$0xff] %v3471_v1  ;;  %v3485_v34 = vadd.f32 %v3252_v56, %v3146_v29  ;;  %v3499_v56 = vadd.f32 %v3250_v53, %v3146_v29 }
 0x189   :  { %4211 = vst [vmem:[#allocation44_spill] sm:$0xff] %v3420_v39  ;;  %v2645_v40 = vpop.eup %2644  ;;  %v3436_v30 = vpop.f32.mrb[31].mxu0  ;;  %v3438_v39 = vmul.f32 1.442695, %v2351_v48  ;;  %v2318_v48 = vmul.f32 -1.702, %v3418_v9  ;;  %2672 = vrcp.f32 %v1334_v35  ;;  %v3475_v35 = vadd.f32 %v3244_v47, %v3143_v26 }
 0x18a   :  { %v2647_v7 = vpop.eup %2646  ;;  %v1336_v59 = vadd.f32 1.0, %v2645_v40  ;;  %v1189_v25 = vmul.f32 1.442695, %v2317_v44  ;;  %2674 = vrcp.f32 %v1335_v43  ;;  %v1193_v47 = vmul.f32 1.442695, %v2319_v0  ;;  %4217 = vst [vmem:[#allocation50_spill] sm:$0xff] %v3499_v56 }
 0x18b   :  { %v2649_v41 = vpop.eup %2648  ;;  %v1301_v55 = vadd.f32 1.0, %v2647_v7  ;;  %v3457_v20 = vpop.f32.mrb[32].mxu1  ;;  %v1191_v60 = vmul.f32 1.442695, %v2318_v48  ;;  %v3481_v7 = vadd.f32 %v3242_v15, %v3143_v26  ;;  %v3508_v0 = vadd.f32 %v3266_v27, %v3146_v29 }
 0x18c   :  { %v2651_v21 = vpop.eup %2650  ;;  %v1302_v8 = vadd.f32 1.0, %v2649_v41  ;;  %v3463_v46 = vpop.f32.mrb[33].mxu1  ;;  %2676 = vrcp.f32 %v1336_v59  ;;  %v3494_v41 = vadd.f32 %v3260_v18, %v3143_v26  ;;  %v2320_v59 = vmul.f32 -1.702, %v3461_v62 }
 0x18d   :  { %v2653_v28 = vpop.eup %2652  ;;  %v3477_v44 = vpop.f32.mrb[34].mxu1  ;;  %4215 = vst [vmem:[#allocation48_spill] sm:$0xff] %v3481_v7  ;;  %v3490_v57 = vmul.f32 %v2651_v21, %v3207_v5  ;;  %2678 = vrcp.f32 %v1301_v55  ;;  %v3503_v5 = vadd.f32 %v3258_v11, %v3143_v26  ;;  %v2321_v21 = vmul.f32 -1.702, %v3475_v35  ;;  %4219 = vst [vmem:[#allocation52_spill] sm:$0xff] %v3508_v0 }
 0x18e   :  { %v2655_v3 = vpop.eup %2654  ;;  %v3487_v58 = vpop.f32.mrb[35].mxu1  ;;  %2680 = vrcp.f32 %v1302_v8  ;;  %v2322_v8 = vmul.f32 -1.702, %v3485_v34  ;;  %v3516_v11 = vadd.f32 %v3268_v32, %v3146_v29  ;;  %v2353_v27 = vmul.f32 -1.702, %v3481_v7 }
 0x18f   :  { %v2657_v40 = vpop.eup %2656  ;;  %4216 = vst [vmem:[#allocation49_spill] sm:$0xff] %v3490_v57  ;;  %2682 = vpow2.f32 %v1189_v25  ;;  %4218 = vst [vmem:[#allocation51_spill] sm:$0xff] %v3503_v5  ;;  %v2323_v25 = vmul.f32 -1.702, %v3494_v41  ;;  %v3525_v57 = vadd.f32 %v3295_v16, %v3143_v26  ;;  %v3532_v1 = vmul.f32 %v2653_v28, %v3214_v10 }
 0x190   :  { %v2659_v50 = vpop.eup %2658  ;;  %v1303_v15 = vadd.f32 1.0, %v2657_v40  ;;  %2684 = vpow2.f32 %v1191_v60  ;;  %4220 = vst [vmem:[#allocation53_spill] sm:$0xff] %v3516_v11  ;;  %v1195_v60 = vmul.f32 1.442695, %v2320_v59  ;;  %v2354_v32 = vmul.f32 -1.702, %v3499_v56 }
 0x191   :  { %v2661_v52 = vpop.eup %2660  ;;  %v1304_v48 = vadd.f32 1.0, %v2659_v50  ;;  %2686 = vpow2.f32 %v1193_v47  ;;  %4221 = vst [vmem:[#allocation54_spill] sm:$0xff] %v3525_v57  ;;  %4223 = vst [vmem:[#allocation56_spill] sm:$0xff] %v3532_v1  ;;  %v1197_v4 = vmul.f32 1.442695, %v2321_v21  ;;  %v3540_v59 = vmul.f32 %v2655_v3, %v3217_v14  ;;  %v4235_v1 = vld [vmem:[#allocation24_spill] sm:$0xff] }
 0x192   :  { %v2663_v43 = vpop.eup %2662  ;;  %v1337_v18 = vadd.f32 1.0, %v2661_v52  ;;  %2688 = vrcp.f32 %v1303_v15  ;;  %v2355_v16 = vmul.f32 -1.702, %v3503_v5  ;;  %v1199_v7 = vmul.f32 1.442695, %v2322_v8 }
 0x193   :  { %v2665_v55 = vpop.eup %2664  ;;  %v1338_v53 = vadd.f32 1.0, %v2663_v43  ;;  %v3518_v50 = vpop.f32.mrb[36].mxu1  ;;  %2690 = vrcp.f32 %v1304_v48  ;;  %v2356_v10 = vmul.f32 -1.702, %v3508_v0  ;;  %v1201_v28 = vmul.f32 1.442695, %v2323_v25 }
 0x194   :  { %v3511_v40 = vpop.eup %2666  ;;  %v3527_v43 = vpop.f32.mrb[37].mxu1  ;;  %2692 = vrcp.f32 %v1337_v18  ;;  %v2324_v48 = vmul.f32 -1.702, %v3516_v11  ;;  %v1261_v56 = vmul.f32 1.442695, %v2353_v27  ;;  %v3554_v3 = vadd.f32 %v3300_v23, %v3146_v29  ;;  %v4230_v27 = vld [vmem:[#allocation21_spill] sm:$0xff] }
 0x195   :  { %v3520_v52 = vpop.eup %2668  ;;  %v3535_v37 = vpop.f32.mrb[38].mxu1  ;;  %2694 = vrcp.f32 %v1338_v53  ;;  %v2357_v14 = vmul.f32 -1.702, %v3525_v57  ;;  %v1263_v8 = vmul.f32 1.442695, %v2354_v32  ;;  %v3558_v53 = vadd.f32 %v3305_v36, %v3143_v26  ;;  %v4232_v23 = vld [vmem:[#allocation22_spill] sm:$0xff] }
 0x196   :  { %v3529_v47 = vpop.eup %2670  ;;  %v3543_v12 = vpop.f32.mrb[39].mxu1  ;;  %2696 = vpow2.f32 %v1195_v60  ;;  %4227 = vst [vmem:[#allocation60_spill] sm:$0xff] %v3554_v3  ;;  %v3562_v25 = vadd.f32 %v3297_v6, %v3143_v26  ;;  %v1265_v60 = vmul.f32 1.442695, %v2355_v16  ;;  %v3566_v57 = vadd.f32 %v4230_v27, %v3146_v29  ;;  %v4237_v16 = vld [vmem:[#allocation12_spill] sm:$0xff] }
 0x197   :  { %4222 = vst [vmem:[#allocation55_spill] sm:$0xff] %v3529_v47  ;;  %v3537_v15 = vpop.eup %2672  ;;  %2698 = vpow2.f32 %v1197_v4  ;;  %4228 = vst [vmem:[#allocation61_spill] sm:$0xff] %v3558_v53  ;;  %v3570_v5 = vadd.f32 %v4232_v23, %v3143_v26  ;;  %v3572_v32 = vmul.f32 1.442695, %v2356_v10  ;;  %v1203_v36 = vmul.f32 1.442695, %v2324_v48 }
 0x198   :  { %4224 = vst [vmem:[#allocation57_spill] sm:$0xff] %v3537_v15  ;;  %v3545_v38 = vpop.eup %2674  ;;  %4229 = vst [vmem:[#allocation62_spill] sm:$0xff] %v3562_v25  ;;  %2700 = vpow2.f32 %v1199_v7  ;;  %v3576_v6 = vadd.f32 %v4235_v1, %v3146_v29  ;;  %v3584_v27 = vmul.f32 1.442695, %v2357_v14  ;;  %v3587_v23 = vmul.f32 -1.702, %v3554_v3 }
 0x199   :  { %4225 = vst [vmem:[#allocation58_spill] sm:$0xff] %v3545_v38  ;;  %v3549_v21 = vpop.eup %2676  ;;  %4231 = vst [vmem:[#allocation21_spill] sm:$0xff] %v3566_v57  ;;  %2702 = vpow2.f32 %v1201_v28  ;;  %v3593_v1 = vmul.f32 -1.702, %v3558_v53  ;;  %v4241_v48 = vld [vmem:[#allocation23_spill] sm:$0xff]  ;;  %v4243_v53 = vld [vmem:[#allocation13_spill] sm:$0xff] }
 0x19a   :  { %4226 = vst [vmem:[#allocation59_spill] sm:$0xff] %v3549_v21  ;;  %v2679_v18 = vpop.eup %2678  ;;  %4233 = vst [vmem:[#allocation22_spill] sm:$0xff] %v3570_v5  ;;  %v3581_v21 = vmul.f32 %v2665_v55, %v4237_v16  ;;  %2704 = vpow2.f32 %v3438_v39  ;;  %v3597_v38 = vadd.f32 %v4241_v48, %v3146_v29  ;;  %v2325_v55 = vmul.f32 -1.702, %v3562_v25  ;;  %v4251_v25 = vld [vmem:[#allocation25_spill] sm:$0xff] }
 0x19b   :  { %v2681_v0 = vpop.eup %2680  ;;  %4234 = vst [vmem:[#allocation63_spill] sm:$0xff] %v3572_v32  ;;  %4236 = vst [vmem:[#allocation24_spill] sm:$0xff] %v3576_v6  ;;  %v3578_v63 = vpop.f32.mrb[40].mxu1  ;;  %2706 = vpow2.f32 %v3449_v19  ;;  %v2326_v3 = vmul.f32 -1.702, %v3566_v57  ;;  %v3610_v15 = vmul.f32 %v3511_v40, %v4243_v53  ;;  %v4248_v40 = vld [vmem:[#allocation14_spill] sm:$0xff] }
 0x19c   :  { %v2683_v4 = vpop.eup %2682  ;;  %4238 = vst [vmem:[#allocation12_spill] sm:$0xff] %v3584_v27  ;;  %4239 = vst [vmem:[#allocation64_spill] sm:$0xff] %v3587_v23  ;;  %v3589_v10 = vpop.f32.mrb[41].mxu1  ;;  %2708 = vpow2.f32 %v1261_v56  ;;  %v2327_v27 = vmul.f32 -1.702, %v3570_v5  ;;  %v4245_v56 = vld [vmem:[#allocation30_spill] sm:$0xff]  ;;  %v3627_v53 = vmul.f32 %v3520_v52, %v4248_v40  ;;  %v879_v52 = vadd.f32 %v3457_v20, %v3389_v31 }
 0x19d   :  { %v2685_v7 = vpop.eup %2684  ;;  %4240 = vst [vmem:[#allocation65_spill] sm:$0xff] %v3593_v1  ;;  %4242 = vst [vmem:[#allocation23_spill] sm:$0xff] %v3597_v38  ;;  %v3600_v39 = vpop.f32.mrb[42].mxu1  ;;  %v1305_v16 = vadd.f32 1.0, %v2683_v4  ;;  %2710 = vpow2.f32 %v1263_v8  ;;  %v2328_v38 = vmul.f32 -1.702, %v3576_v6  ;;  %v3617_v1 = vadd.f32 %v4245_v56, %v3143_v26 }
 0x19e   :  { %v2687_v28 = vpop.eup %2686  ;;  %v3604_v13 = vpop.f32.mrb[43].mxu1  ;;  %v1306_v48 = vadd.f32 1.0, %v2685_v7  ;;  %2712 = vpow2.f32 %v1203_v36  ;;  %v4246_v23 = vld [vmem:[#allocation32_spill] sm:$0xff]  ;;  %v4249_v8 = vld [vmem:[#allocation19_spill] sm:$0xff]  ;;  %v1207_v56 = vmul.f32 1.442695, %v2326_v3  ;;  %v881_v20 = vadd.f32 %v3463_v46, %v3392_v24 }
 0x19f   :  { %v2689_v14 = vpop.eup %2688  ;;  %v1307_v4 = vadd.f32 1.0, %v2687_v28  ;;  %v3621_v32 = vadd.f32 %v4246_v23, %v3146_v29  ;;  %v3630_v7 = vmul.f32 %v2679_v18, %v4249_v8  ;;  %2714 = vpow2.f32 %v1265_v60 }
 0x1a0   :  { %v3606_v19 = vpop.eup %2690  ;;  %v1205_v28 = vmul.f32 1.442695, %v2325_v55  ;;  %2716 = vrcp.f32 %v1305_v16  ;;  %v1209_v57 = vmul.f32 1.442695, %v2327_v27  ;;  %v3636_v11 = vmul.f32 %v2689_v14, %v4251_v25 }
 0x1a1   :  { %v3613_v47 = vpop.eup %2692  ;;  %2718 = vrcp.f32 %v1306_v48  ;;  %v2329_v55 = vmul.f32 -1.702, %v3617_v1  ;;  %v883_v40 = vadd.f32 %v3477_v44, %v3389_v31  ;;  %v1550_v46 = vmul.f32 %v3443_v51, %v881_v20 }
 0x1a2   :  { %4244 = vst [vmem:[#allocation13_spill] sm:$0xff] %v3613_v47  ;;  %v3623_v5 = vpop.eup %2694  ;;  %v4250_v47 = vld [vmem:[#allocation20_spill] sm:$0xff]  ;;  %2720 = vrcp.f32 %v1307_v4  ;;  %v4252_v4 = vld [vmem:[#allocation35_spill] sm:$0xff]  ;;  %v889_v44 = vadd.f32 %v3518_v50, %v3389_v31  ;;  %v891_v51 = vadd.f32 %v3527_v43, %v3392_v24 }
 0x1a3   :  { %4247 = vst [vmem:[#allocation30_spill] sm:$0xff] %v3623_v5  ;;  %v2697_v36 = vpop.eup %2696  ;;  %v3633_v6 = vmul.f32 %v2681_v0, %v4250_v47  ;;  %v1211_v5 = vmul.f32 1.442695, %v2328_v38  ;;  %v3640_v18 = vpop.f32.mrb[44].mxu1  ;;  %v2330_v0 = vmul.f32 -1.702, %v3621_v32  ;;  %v3646_v47 = vadd.f32 %v3364_v33, %v3143_v26 }
 0x1a4   :  { %v2699_v23 = vpop.eup %2698  ;;  %v3648_v3 = vpop.f32.mrb[45].mxu1  ;;  %v1308_v27 = vadd.f32 1.0, %v2697_v36  ;;  %2722 = vpow2.f32 %v1205_v28  ;;  %v1549_v38 = vmul.f32 %v3430_v22, %v879_v52  ;;  %v3659_v33 = vadd.f32 %v4252_v4, %v3146_v29 }
 0x1a5   :  { %v2701_v60 = vpop.eup %2700  ;;  %v3653_v14 = vpop.f32.mrb[46].mxu1  ;;  %v1309_v48 = vadd.f32 1.0, %v2699_v23  ;;  %2724 = vpow2.f32 %v1207_v56  ;;  %v885_v36 = vadd.f32 %v3487_v58, %v3392_v24  ;;  %v1551_v52 = vmul.f32 %v3447_v45, %v883_v40 }
 0x1a6   :  { %v2703_v25 = vpop.eup %2702  ;;  %v3663_v8 = vpop.f32.mrb[47].mxu1  ;;  %v1310_v22 = vadd.f32 1.0, %v2701_v60  ;;  %2726 = vpow2.f32 %v1209_v57  ;;  %v2331_v60 = vmul.f32 -1.702, %v3646_v47  ;;  %v3683_v45 = vmul.f32 %v3540_v59, %v889_v44 }
 0x1a7   :  { %v3655_v16 = vpop.eup %2704  ;;  %v1311_v56 = vadd.f32 1.0, %v2703_v25  ;;  %2728 = vpow2.f32 %v1211_v5  ;;  %v1552_v57 = vmul.f32 %v3454_v54, %v885_v36  ;;  %v2332_v25 = vmul.f32 -1.702, %v3659_v33  ;;  %v4253_v36 = vld [vmem:[#allocation26_spill] sm:$0xff] }
 0x1a8   :  { %v3665_v28 = vpop.eup %2706  ;;  %2730 = vrcp.f32 %v1308_v27  ;;  %v1677_v5 = vpack.c.bf16 %v1551_v52, %v1549_v38  ;;  %v1554_v27 = vmul.f32 %v3581_v21, %v891_v51  ;;  %v893_v54 = vadd.f32 %v3535_v37, %v3389_v31 }
 0x1a9   :  { %v3670_v23 = vpop.eup %2708  ;;  %2732 = vrcp.f32 %v1309_v48  ;;  %v1496_v48 = vmul.f32 %v3606_v19, %v4253_v36  ;;  %v1678_v38 = vpack.c.bf16 %v1552_v57, %v1550_v46  ;;  %v895_v59 = vadd.f32 %v3543_v12, %v3392_v24 }
 0x1aa   :  { %v3675_v4 = vpop.eup %2710  ;;  %2734 = vrcp.f32 %v1310_v22  ;;  %v3698_v44 = vmul.f32 1.442695, %v2329_v55  ;;  %v3700_v21 = vmul.f32 1.442695, %v2330_v0  ;;  %v1555_v37 = vmul.f32 %v3610_v15, %v893_v54 }
 0x1ab   :  { %v2713_v58 = vpop.eup %2712  ;;  %v3690_v40 = vpop.f32.mrb[48].mxu1  ;;  %2736 = vrcp.f32 %v1311_v56  ;;  %v899_v51 = vadd.f32 %v3578_v63, %v3389_v31  ;;  %v3707_v46 = vmul.f32 1.442695, %v2331_v60  ;;  %1933 = vmatprep.mubr.bf16.mxu0 %v1678_v38  ;;  %v1556_v12 = vmul.f32 %v3627_v53, %v895_v59 }
 0x1ac   :  { %v3685_v20 = vpop.eup %2714  ;;  %v1312_v50 = vadd.f32 1.0, %v2713_v58  ;;  %v3696_v52 = vpop.f32.mrb[49].mxu1  ;;  %v901_v55 = vadd.f32 %v3589_v10, %v3392_v24  ;;  %v3714_v57 = vmul.f32 1.442695, %v2332_v25  ;;  %v3718_v63 = vadd.f32 %v3401_v49, %v3143_v26  ;;  %1934 = vmatmul.mubr.bf16.vlgmr.msra.gmra.mrb[32].mxu0 %v1677_v5 }
 0x1ad   :  { %v2717_v43 = vpop.eup %2716  ;;  %v3705_v58 = vpop.f32.mrb[50].mxu1  ;;  %v3721_v15 = vmul.f32 %v3630_v7, %v899_v51  ;;  %v903_v60 = vadd.f32 %v3600_v39, %v3389_v31  ;;  %v1680_v36 = vpack.c.bf16 %v1556_v12, %v1554_v27  ;;  %v905_v7 = vadd.f32 %v3604_v13, %v3392_v24 }
 0x1ae   :  { %v2719_v22 = vpop.eup %2718  ;;  %2738 = vrcp.f32 %v1312_v50  ;;  %v3712_v56 = vpop.f32.mrb[51].mxu1  ;;  %v1497_v50 = vmul.f32 %v2717_v43, %v3397_v42  ;;  %v1558_v54 = vmul.f32 %v3633_v6, %v901_v55  ;;  %v1679_v42 = vpack.c.bf16 %v1555_v37, %v3683_v45 }
 0x1af   :  { %v2721_v19 = vpop.eup %2720  ;;  %v1498_v38 = vmul.f32 %v2719_v22, %v3418_v9  ;;  %v3729_v49 = vmul.f32 %v3636_v11, %v903_v60  ;;  %1943 = vmatprep.mubr.bf16.mxu0 %v1680_v36  ;;  %v909_v6 = vadd.f32 %v3640_v18, %v3389_v31  ;;  %v1560_v9 = vmul.f32 %v1496_v48, %v905_v7  ;;  %v4254_v7 = vld [vmem:[#allocation53_spill] sm:$0xff] }
 0x1b0   :  { %v2723_v0 = vpop.eup %2722  ;;  %v911_v11 = vadd.f32 %v3648_v3, %v3392_v24  ;;  %v1499_v13 = vmul.f32 %v2721_v19, %v3434_v61  ;;  %v913_v45 = vadd.f32 %v3653_v14, %v3389_v31  ;;  %v3745_v18 = vadd.f32 %v3413_v2, %v3146_v29 }
 0x1b1   :  { %v2725_v53 = vpop.eup %2724  ;;  %v1313_v10 = vadd.f32 1.0, %v2723_v0  ;;  %v3739_v12 = vmul.f32 %v1497_v50, %v909_v6  ;;  %v1682_v0 = vpack.c.bf16 %v1560_v9, %v1558_v54  ;;  %v3750_v61 = vadd.f32 %v3422_v17, %v3143_v26 }
 0x1b2   :  { %v2727_v25 = vpop.eup %2726  ;;  %v1314_v59 = vadd.f32 1.0, %v2725_v53  ;;  %v1562_v48 = vmul.f32 %v1498_v38, %v911_v11  ;;  %v3752_v19 = vmul.f32 %v1499_v13, %v913_v45  ;;  %v915_v14 = vadd.f32 %v3663_v8, %v3392_v24  ;;  %v4256_v13 = vld [vmem:[#allocation21_spill] sm:$0xff] }
 0x1b3   :  { %v2729_v5 = vpop.eup %2728  ;;  %2740 = vrcp.f32 %v1313_v10  ;;  %v1315_v39 = vadd.f32 1.0, %v2727_v25  ;;  %v928_v22 = vpop.f32.mrb[52].mxu1  ;;  %v2333_v2 = vmul.f32 -1.702, %v3718_v63  ;;  %v1681_v54 = vpack.c.bf16 %v3729_v49, %v3721_v15 }
 0x1b4   :  { %v2731_v27 = vpop.eup %2730  ;;  %2742 = vrcp.f32 %v1314_v59  ;;  %v1316_v43 = vadd.f32 1.0, %v2729_v5  ;;  %v930_v37 = vpop.f32.mrb[53].mxu1  ;;  %1944 = vmatmul.mubr.bf16.gmra.mrb[36].mxu0 %v1679_v42  ;;  %v3765_v25 = vadd.f32 %v3436_v30, %v3146_v29  ;;  %v2334_v59 = vmul.f32 -1.702, %v3745_v18 }
 0x1b5   :  { %v2733_v51 = vpop.eup %2732  ;;  %2744 = vrcp.f32 %v1315_v39  ;;  %v932_v3 = vpop.f32.mrb[54].mxu1  ;;  %v1500_v53 = vmul.f32 %v2731_v27, %v3461_v62  ;;  %v919_v62 = vadd.f32 %v3690_v40, %v3389_v31  ;;  %1953 = vmatprep.mubr.bf16.mxu0 %v1682_v0  ;;  %v923_v40 = vadd.f32 %v3705_v58, %v3389_v31 }
 0x1b6   :  { %v2735_v55 = vpop.eup %2734  ;;  %2746 = vrcp.f32 %v1316_v43  ;;  %v934_v50 = vpop.f32.mrb[55].mxu1  ;;  %v1501_v10 = vmul.f32 %v2733_v51, %v3475_v35  ;;  %v921_v35 = vadd.f32 %v3696_v52, %v3392_v24  ;;  %v1683_v58 = vpack.c.bf16 %v3752_v19, %v3739_v12  ;;  %v4255_v43 = vld [vmem:[#allocation62_spill] sm:$0xff] }
 0x1b7   :  { %v2737_v60 = vpop.eup %2736  ;;  %v1502_v17 = vmul.f32 %v2735_v55, %v3485_v34  ;;  %v1564_v8 = vmul.f32 %v1500_v53, %v915_v14  ;;  %2748 = vpow2.f32 %v3698_v44  ;;  %v2335_v34 = vmul.f32 -1.702, %v3750_v61  ;;  %v4258_v14 = vld [vmem:[#allocation24_spill] sm:$0xff] }
 0x1b8   :  { %v2739_v36 = vpop.eup %2738  ;;  %v1503_v38 = vmul.f32 %v2737_v60, %v3494_v41  ;;  %v3771_v15 = vmul.f32 %v1501_v10, %v919_v62  ;;  %2750 = vpow2.f32 %v3700_v21  ;;  %v925_v41 = vadd.f32 %v3712_v56, %v3392_v24  ;;  %v4257_v60 = vld [vmem:[#allocation22_spill] sm:$0xff] }
 0x1b9   :  { %v3777_v30 = vmul.f32 %v1502_v17, %v921_v35  ;;  %v1684_v49 = vpack.c.bf16 %v1564_v8, %v1562_v48  ;;  %v1504_v5 = vmul.f32 %v2739_v36, %v4254_v7  ;;  %2752 = vpow2.f32 %v3707_v46  ;;  %v4260_v36 = vld [vmem:[#allocation29_spill] sm:$0xff] }
 0x1ba   :  { %v3781_v52 = vmul.f32 %v1503_v38, %v923_v40  ;;  %v2336_v44 = vmul.f32 -1.702, %v3765_v25  ;;  %v929_v6 = vadd.f32 %v928_v22, %v3389_v31  ;;  %2754 = vpow2.f32 %v3714_v57  ;;  %v4261_v38 = vld [vmem:[#allocation31_spill] sm:$0xff] }
 0x1bb   :  { %v3785_v39 = vpop.f32.mrb[56].mxu1  ;;  %v1568_v56 = vmul.f32 %v1504_v5, %v925_v41  ;;  %v931_v11 = vadd.f32 %v930_v37, %v3392_v24  ;;  %v1221_v55 = vmul.f32 1.442695, %v2333_v2  ;;  %v933_v12 = vadd.f32 %v932_v3, %v3389_v31  ;;  %v4264_v5 = vld [vmem:[#allocation33_spill] sm:$0xff] }
 0x1bc   :  { %v3792_v27 = vpop.f32.mrb[57].mxu1  ;;  %v935_v22 = vadd.f32 %v934_v50, %v3392_v24  ;;  %v1223_v19 = vmul.f32 1.442695, %v2334_v59  ;;  %1954 = vmatmul.mubr.bf16.gmra.mrb[40].mxu0 %v1681_v54  ;;  %v1225_v62 = vmul.f32 1.442695, %v2335_v34  ;;  %v1685_v3 = vpack.c.bf16 %v3781_v52, %v3771_v15  ;;  %v4259_v50 = vld [vmem:[#allocation63_spill] sm:$0xff] }
 0x1bd   :  { %v2741_v42 = vpop.eup %2740  ;;  %v3797_v51 = vpop.f32.mrb[58].mxu1  ;;  %v1686_v37 = vpack.c.bf16 %v1568_v56, %v3777_v30  ;;  %1963 = vmatprep.mubr.bf16.mxu0 %v1684_v49  ;;  %2756 = vpow2.f32 %v4259_v50  ;;  %v3816_v17 = vadd.f32 %v4260_v36, %v3143_v26  ;;  %v1227_v54 = vmul.f32 1.442695, %v2336_v44  ;;  %v4262_v34 = vld [vmem:[#allocation64_spill] sm:$0xff]  ;;  %v4263_v49 = vld [vmem:[#allocation65_spill] sm:$0xff]  ;;  %v4265_v44 = vld [vmem:[#allocation34_spill] sm:$0xff] }
 0x1be   :  { %v2743_v21 = vpop.eup %2742  ;;  %v1505_v9 = vmul.f32 %v2741_v42, %v4255_v43  ;;  %v3802_v48 = vpop.f32.mrb[59].mxu1  ;;  %v1339_v35 = vadd.f32 1.0, %v3655_v16  ;;  %v3823_v59 = vadd.f32 %v4261_v38, %v3146_v29  ;;  %2758 = vpow2.f32 %v1221_v55  ;;  %v4281_v52 = vld [vmem:[#allocation40_spill] sm:$0xff] }
 0x1bf   :  { %v2745_v46 = vpop.eup %2744  ;;  %v1506_v45 = vmul.f32 %v2743_v21, %v4256_v13  ;;  %v3828_v30 = vmul.f32 1.442695, %v4262_v34  ;;  %v3831_v7 = vmul.f32 1.442695, %v4263_v49  ;;  %v3835_v41 = vadd.f32 %v4264_v5, %v3143_v26  ;;  %v4269_v34 = vld [vmem:[#allocation16_spill] sm:$0xff]  ;;  %v4270_v49 = vld [vmem:[#allocation57_spill] sm:$0xff] }
 0x1c0   :  { %v2747_v0 = vpop.eup %2746  ;;  %v1507_v53 = vmul.f32 %v2745_v46, %v4257_v60  ;;  %v3805_v57 = vmul.f32 %v1505_v9, %v929_v6  ;;  %2760 = vpow2.f32 %v1223_v19  ;;  %v3841_v6 = vadd.f32 %v4265_v44, %v3146_v29  ;;  %v4267_v46 = vld [vmem:[#allocation55_spill] sm:$0xff] }
 0x1c1   :  { %v1508_v10 = vmul.f32 %v2747_v0, %v4258_v14  ;;  %v3809_v2 = vmul.f32 %v1506_v45, %v931_v11  ;;  %v2749_v16 = vpop.eup %2748  ;;  %2762 = vpow2.f32 %v1225_v62  ;;  %v4266_v11 = vld [vmem:[#allocation15_spill] sm:$0xff]  ;;  %v2361_v60 = vmul.f32 -1.702, %v3816_v17 }
 0x1c2   :  { %v3818_v8 = vmul.f32 %v1507_v53, %v933_v12  ;;  %v2751_v56 = vpop.eup %2750  ;;  %v3851_v13 = vmul.f32 %v4267_v46, %v4266_v11  ;;  %v4268_v45 = vld [vmem:[#allocation23_spill] sm:$0xff]  ;;  %v1317_v12 = vadd.f32 1.0, %v2749_v16  ;;  %2764 = vpow2.f32 %v1227_v54 }
 0x1c3   :  { %v3825_v40 = vmul.f32 %v1508_v10, %v935_v22  ;;  %v3837_v42 = vpop.f32.mrb[60].mxu1  ;;  %v2360_v55 = vmul.f32 -1.702, %v4268_v45  ;;  %v2753_v0 = vpop.eup %2752  ;;  %2766 = vrcp.f32 %v1339_v35  ;;  %v2362_v53 = vmul.f32 -1.702, %v3823_v59 }
 0x1c4   :  { %v3847_v9 = vpop.f32.mrb[61].mxu1  ;;  %v1318_v19 = vadd.f32 1.0, %v2751_v56  ;;  %v2755_v10 = vpop.eup %2754  ;;  %v1340_v62 = vadd.f32 1.0, %v3665_v28  ;;  %v2363_v50 = vmul.f32 -1.702, %v3835_v41  ;;  %2768 = vrcp.f32 %v1317_v12  ;;  %1964 = vmatmul.mubr.bf16.gmra.mrb[44].mxu0 %v1683_v58  ;;  %v4271_v28 = vld [vmem:[#allocation39_spill] sm:$0xff] }
 0x1c5   :  { %v3854_v22 = vpop.f32.mrb[62].mxu1  ;;  %v1319_v36 = vadd.f32 1.0, %v2753_v0  ;;  %v1341_v54 = vadd.f32 1.0, %v3670_v23  ;;  %v2364_v38 = vmul.f32 -1.702, %v3841_v6  ;;  %v1320_v35 = vadd.f32 1.0, %v2755_v10  ;;  %1973 = vmatprep.mubr.bf16.mxu0 %v1686_v37 }
 0x1c6   :  { %v3858_v14 = vpop.f32.mrb[63].mxu1  ;;  %2770 = vrcp.f32 %v1318_v19  ;;  %v3866_v5 = vmul.f32 %v4270_v49, %v4269_v34  ;;  %v1342_v16 = vadd.f32 1.0, %v3675_v4  ;;  %v3871_v44 = vadd.f32 %v4271_v28, %v3143_v26  ;;  %v4272_v56 = vld [vmem:[#allocation17_spill] sm:$0xff]  ;;  %v4273_v58 = vld [vmem:[#allocation58_spill] sm:$0xff]  ;;  %v4275_v0 = vld [vmem:[#allocation59_spill] sm:$0xff] }
 0x1c7   :  { %2772 = vrcp.f32 %v1319_v36  ;;  %v3875_v11 = vmul.f32 %v4273_v58, %v4272_v56  ;;  %v3877_v23 = vmul.f32 1.442695, %v2360_v55  ;;  %v3879_v46 = vmul.f32 1.442695, %v2361_v60  ;;  %v2757_v37 = vpop.eup %2756  ;;  %v4274_v12 = vld [vmem:[#allocation18_spill] sm:$0xff] }
 0x1c8   :  { %2774 = vrcp.f32 %v1320_v35  ;;  %v3883_v19 = vmul.f32 %v4275_v0, %v4274_v12  ;;  %v3885_v4 = vmul.f32 1.442695, %v2362_v53  ;;  %v3887_v10 = vmul.f32 1.442695, %v2363_v50  ;;  %v2759_v34 = vpop.eup %2758  ;;  %v4276_v12 = vld [vmem:[#allocation12_spill] sm:$0xff]  ;;  %v4277_v0 = vld [vmem:[#allocation38_spill] sm:$0xff] }
 0x1c9   :  { %2776 = vrcp.f32 %v1340_v62  ;;  %v1343_v49 = vadd.f32 1.0, %v3685_v20  ;;  %v3890_v55 = vmul.f32 1.442695, %v2364_v38  ;;  %v3894_v56 = vmul.f32 -1.702, %v3871_v44 }
 0x1ca   :  { %2778 = vrcp.f32 %v1341_v54  ;;  %v2761_v28 = vpop.eup %2760  ;;  %v1321_v62 = vadd.f32 1.0, %v2759_v34  ;;  %v4278_v34 = vld [vmem:[#allocation41_spill] sm:$0xff] }
 0x1cb   :  { %v958_v36 = vpop.f32.mrb[64].mxu1  ;;  %2780 = vrcp.f32 %v1342_v16  ;;  %v2763_v58 = vpop.eup %2762  ;;  %v1322_v54 = vadd.f32 1.0, %v2761_v28  ;;  %v939_v28 = vadd.f32 %v3785_v39, %v3389_v31 }
 0x1cc   :  { %v959_v60 = vadd.f32 %v958_v36, %v3389_v31  ;;  %v960_v35 = vpop.f32.mrb[65].mxu1  ;;  %2782 = vpow2.f32 %v4276_v12  ;;  %v2765_v43 = vpop.eup %2764  ;;  %v1323_v16 = vadd.f32 1.0, %v2763_v58  ;;  %1974 = vmatmul.mubr.bf16.gmra.mrb[48].mxu0 %v1685_v3  ;;  %v3921_v3 = vadd.f32 %v4281_v52, %v3146_v29 }
 0x1cd   :  { %v961_v53 = vadd.f32 %v960_v35, %v3392_v24  ;;  %v962_v50 = vpop.f32.mrb[66].mxu1  ;;  %2784 = vrcp.f32 %v1321_v62  ;;  %v3909_v12 = vpop.eup %2766  ;;  %v4279_v62 = vpack.c.bf16 %v3825_v40, %v3809_v2  ;;  %v943_v2 = vadd.f32 %v3797_v51, %v3389_v31 }
 0x1ce   :  { %v3899_v20 = vmul.f32 %v4277_v0, %v959_v60  ;;  %v963_v38 = vadd.f32 %v962_v50, %v3389_v31  ;;  %v964_v36 = vpop.f32.mrb[67].mxu1  ;;  %2786 = vrcp.f32 %v1322_v54  ;;  %v1324_v60 = vadd.f32 1.0, %v2765_v43  ;;  %v4280_v50 = vld [vmem:[#allocation42_spill] sm:$0xff]  ;;  %v2769_v15 = vpop.eup %2768  ;;  %v4282_v43 = vld [vmem:[#allocation45_spill] sm:$0xff] }
 0x1cf   :  { %v3906_v35 = vmul.f32 %v4278_v34, %v961_v53  ;;  %v965_v21 = vadd.f32 %v964_v36, %v3392_v24  ;;  %1983 = vmatprep.mubr.bf16.mxu0 %v4279_v62  ;;  %2788 = vrcp.f32 %v1323_v16  ;;  %v941_v53 = vadd.f32 %v3792_v27, %v3392_v24 }
 0x1d0   :  { %v3917_v58 = vmul.f32 %v4280_v50, %v963_v38  ;;  %v2771_v39 = vpop.eup %2770  ;;  %v1509_v0 = vmul.f32 %v2769_v15, %v3617_v1  ;;  %2790 = vrcp.f32 %v1324_v60  ;;  %v945_v27 = vadd.f32 %v3802_v48, %v3392_v24 }
 0x1d1   :  { %v3926_v54 = vmul.f32 %v4282_v43, %v965_v21  ;;  %v2773_v38 = vpop.eup %2772  ;;  %2792 = vpow2.f32 %v3828_v30  ;;  %v1510_v36 = vmul.f32 %v2771_v39, %v3621_v32  ;;  %v3946_v32 = vadd.f32 1.0, %v2757_v37  ;;  %v4284_v39 = vld [vmem:[#allocation46_spill] sm:$0xff] }
 0x1d2   :  { %v1693_v40 = vpack.c.bf16 %v3917_v58, %v3899_v20  ;;  %v2775_v1 = vpop.eup %2774  ;;  %2794 = vpow2.f32 %v3831_v7  ;;  %v1511_v51 = vmul.f32 %v2773_v38, %v3646_v47  ;;  %v3941_v34 = vmul.f32 %v1509_v0, %v939_v28  ;;  %v4283_v7 = vld [vmem:[#allocation43_spill] sm:$0xff] }
 0x1d3   :  { %v968_v21 = vpop.f32.mrb[68].mxu1  ;;  %v1694_v16 = vpack.c.bf16 %v3926_v54, %v3906_v35  ;;  %v3944_v30 = vpop.eup %2776  ;;  %v1512_v48 = vmul.f32 %v2775_v1, %v3659_v33  ;;  %v1574_v50 = vmul.f32 %v1510_v36, %v941_v53  ;;  %v3954_v47 = vadd.f32 %v4283_v7, %v3143_v26  ;;  %v4286_v36 = vld [vmem:[#allocation47_spill] sm:$0xff] }
 0x1d4   :  { %v969_v60 = vadd.f32 %v968_v21, %v3389_v31  ;;  %v970_v62 = vpop.f32.mrb[69].mxu1  ;;  %v3950_v43 = vpop.eup %2778  ;;  %v1575_v28 = vmul.f32 %v1511_v51, %v943_v2  ;;  %2796 = vrcp.f32 %v1343_v49  ;;  %v4285_v53 = vpack.c.bf16 %v3818_v8, %v3805_v57  ;;  %v4287_v51 = vld [vmem:[#allocation44_spill] sm:$0xff] }
 0x1d5   :  { %v971_v15 = vadd.f32 %v970_v62, %v3392_v24  ;;  %v972_v52 = vpop.f32.mrb[70].mxu1  ;;  %v3960_v21 = vpop.eup %2780  ;;  %v1576_v33 = vmul.f32 %v1512_v48, %v945_v27  ;;  %v949_v62 = vadd.f32 %v3837_v42, %v3389_v31  ;;  %v4288_v27 = vld [vmem:[#allocation49_spill] sm:$0xff]  ;;  %2798 = vpow2.f32 %v3877_v23 }
 0x1d6   :  { %v3957_v0 = vmul.f32 %v4284_v39, %v969_v60  ;;  %v973_v38 = vadd.f32 %v972_v52, %v3389_v31  ;;  %v974_v37 = vpop.f32.mrb[71].mxu1  ;;  %1984 = vmatmul.mubr.bf16.gmra.mrb[52].mxu0 %v4285_v53  ;;  %v2783_v2 = vpop.eup %2782  ;;  %v3971_v60 = vadd.f32 %v4287_v51, %v3146_v29  ;;  %v1689_v49 = vpack.c.bf16 %v1575_v28, %v3941_v34  ;;  %v4289_v52 = vld [vmem:[#allocation56_spill] sm:$0xff] }
 0x1d7   :  { %v3966_v1 = vmul.f32 %v4286_v36, %v971_v15  ;;  %v975_v26 = vadd.f32 %v974_v37, %v3392_v24  ;;  %v2785_v57 = vpop.eup %2784  ;;  %v951_v8 = vadd.f32 %v3847_v9, %v3392_v24  ;;  %v1690_v15 = vpack.c.bf16 %v1576_v33, %v1574_v50 }
 0x1d8   :  { %v3977_v48 = vmul.f32 %v4288_v27, %v973_v38  ;;  %v2787_v29 = vpop.eup %2786  ;;  %v2366_v39 = vmul.f32 -1.702, %v3921_v3  ;;  %v1513_v42 = vmul.f32 %v2785_v57, %v3718_v63  ;;  %v953_v34 = vadd.f32 %v3854_v22, %v3389_v31 }
 0x1d9   :  { %v3983_v7 = vmul.f32 %v4289_v52, %v975_v26  ;;  %v2789_v38 = vpop.eup %2788  ;;  %v2367_v23 = vmul.f32 -1.702, %v3954_v47  ;;  %v1514_v9 = vmul.f32 %v2787_v29, %v3745_v18  ;;  %1993 = vmatprep.mubr.bf16.mxu0 %v1690_v15  ;;  %v955_v50 = vadd.f32 %v3858_v14, %v3392_v24 }
 0x1da   :  { %v2791_v63 = vpop.eup %2790  ;;  %v2368_v53 = vmul.f32 -1.702, %v3971_v60  ;;  %v1515_v22 = vmul.f32 %v2789_v38, %v3750_v61  ;;  %v1577_v36 = vmul.f32 %v1513_v42, %v949_v62  ;;  %2800 = vpow2.f32 %v3879_v46 }
 0x1db   :  { %v978_v37 = vpop.f32.mrb[72].mxu1  ;;  %v1696_v33 = vpack.c.bf16 %v3983_v7, %v3966_v1  ;;  %v2793_v27 = vpop.eup %2792  ;;  %v1516_v18 = vmul.f32 %v2791_v63, %v3765_v25  ;;  %v1578_v57 = vmul.f32 %v1514_v9, %v951_v8  ;;  %2802 = vpow2.f32 %v3885_v4  ;;  %v4291_v63 = vld [vmem:[#allocation13_spill] sm:$0xff]  ;;  %v4300_v1 = vld [vmem:[#allocation54_spill] sm:$0xff] }
 0x1dc   :  { %v979_v26 = vadd.f32 %v978_v37, %v3389_v31  ;;  %v980_v51 = vpop.f32.mrb[73].mxu1  ;;  %v2795_v52 = vpop.eup %2794  ;;  %v1579_v29 = vmul.f32 %v1515_v22, %v953_v34  ;;  %v1345_v42 = vadd.f32 1.0, %v2783_v2  ;;  %v1346_v8 = vadd.f32 1.0, %v2793_v27 }
 0x1dd   :  { %v981_v14 = vadd.f32 %v980_v51, %v3392_v24  ;;  %v982_v15 = vpop.f32.mrb[74].mxu1  ;;  %v1580_v38 = vmul.f32 %v1516_v18, %v955_v50  ;;  %2804 = vpow2.f32 %v3887_v10  ;;  %v1347_v34 = vadd.f32 1.0, %v2795_v52  ;;  %v4290_v50 = vld [vmem:[#allocation27_spill] sm:$0xff]  ;;  %v4294_v18 = vld [vmem:[#allocation36_spill] sm:$0xff] }
 0x1de   :  { %v4005_v28 = vmul.f32 %v3851_v13, %v979_v26  ;;  %v983_v61 = vadd.f32 %v982_v15, %v3389_v31  ;;  %v984_v62 = vpop.f32.mrb[75].mxu1  ;;  %1994 = vmatmul.mubr.bf16.gmra.mrb[56].mxu0 %v1689_v49  ;;  %v1691_v9 = vpack.c.bf16 %v1579_v29, %v1577_v36  ;;  %v2797_v13 = vpop.eup %2796  ;;  %2806 = vpow2.f32 %v3890_v55  ;;  %v4293_v26 = vld [vmem:[#allocation30_spill] sm:$0xff] }
 0x1df   :  { %v4009_v46 = vmul.f32 %v3866_v5, %v981_v14  ;;  %v985_v25 = vadd.f32 %v984_v62, %v3392_v24  ;;  %v1692_v37 = vpack.c.bf16 %v1580_v38, %v1578_v57  ;;  %2808 = vrcp.f32 %v3946_v32  ;;  %v2799_v10 = vpop.eup %2798 }
 0x1e0   :  { %v4014_v4 = vmul.f32 %v3875_v11, %v983_v61  ;;  %v1285_v5 = vmul.f32 1.442695, %v3894_v56  ;;  %v1529_v11 = vmul.f32 %v4291_v63, %v4290_v50  ;;  %2810 = vrcp.f32 %v1345_v42 }
 0x1e1   :  { %v4018_v2 = vmul.f32 %v3883_v19, %v985_v25  ;;  %v1287_v22 = vmul.f32 1.442695, %v2366_v39  ;;  %2003 = vmatprep.mubr.bf16.mxu0 %v1692_v37  ;;  %v4292_v19 = vld [vmem:[#allocation28_spill] sm:$0xff]  ;;  %2812 = vrcp.f32 %v1346_v8  ;;  %v1289_v32 = vmul.f32 1.442695, %v2367_v23  ;;  %v4295_v23 = vld [vmem:[#allocation37_spill] sm:$0xff] }
 0x1e2   :  { %v1697_v49 = vpack.c.bf16 %v4014_v4, %v4005_v28  ;;  %v1530_v51 = vmul.f32 %v4293_v26, %v4292_v19  ;;  %v1531_v57 = vmul.f32 %v3909_v12, %v4294_v18  ;;  %2814 = vrcp.f32 %v1347_v34  ;;  %v4297_v19 = vld [vmem:[#allocation50_spill] sm:$0xff]  ;;  %v4298_v18 = vld [vmem:[#allocation51_spill] sm:$0xff] }
 0x1e3   :  { %v988_v36 = vpop.f32.mrb[76].mxu1  ;;  %v1698_v55 = vpack.c.bf16 %v4018_v2, %v4009_v46  ;;  %v1291_v14 = vmul.f32 1.442695, %v2368_v53  ;;  %v1348_v52 = vadd.f32 1.0, %v2799_v10  ;;  %2816 = vpow2.f32 %v1285_v5 }
 0x1e4   :  { %v989_v56 = vadd.f32 %v988_v36, %v3389_v31  ;;  %v990_v27 = vpop.f32.mrb[77].mxu1  ;;  %v2801_v42 = vpop.eup %2800  ;;  %v1532_v38 = vmul.f32 %v3944_v30, %v4295_v23  ;;  %2818 = vpow2.f32 %v1287_v22  ;;  %v1534_v26 = vmul.f32 %v3960_v21, %v4297_v19  ;;  %v4302_v19 = vld [vmem:[#allocation61_spill] sm:$0xff] }
 0x1e5   :  { %v991_v39 = vadd.f32 %v990_v27, %v3392_v24  ;;  %v992_v15 = vpop.f32.mrb[78].mxu1  ;;  %v2803_v53 = vpop.eup %2802  ;;  %2820 = vpow2.f32 %v1289_v32  ;;  %v1349_v5 = vadd.f32 1.0, %v2801_v42 }
 0x1e6   :  { %v4034_v29 = vmul.f32 %v1529_v11, %v989_v56  ;;  %v993_v61 = vadd.f32 %v992_v15, %v3389_v31  ;;  %v994_v62 = vpop.f32.mrb[79].mxu1  ;;  %2004 = vmatmul.mubr.bf16.gmra.mrb[60].mxu0 %v1691_v9  ;;  %2822 = vpow2.f32 %v1291_v14  ;;  %v4296_v11 = vld [vmem:[#allocation48_spill] sm:$0xff]  ;;  %v1350_v54 = vadd.f32 1.0, %v2803_v53 }
 0x1e7   :  { %v4039_v25 = vmul.f32 %v1530_v51, %v991_v39  ;;  %v995_v12 = vadd.f32 %v994_v62, %v3392_v24  ;;  %2013 = vmatprep.mubr.bf16.mxu0 %v1694_v16  ;;  %v2805_v37 = vpop.eup %2804  ;;  %2824 = vrcp.f32 %v1348_v52  ;;  %v1533_v35 = vmul.f32 %v3950_v43, %v4296_v11  ;;  %v4301_v11 = vld [vmem:[#allocation60_spill] sm:$0xff] }
 0x1e8   :  { %v4045_v8 = vmul.f32 %v1531_v57, %v993_v61  ;;  %v2807_v9 = vpop.eup %2806  ;;  %v1351_v51 = vadd.f32 1.0, %v2805_v37  ;;  %v1535_v57 = vmul.f32 %v2797_v13, %v4298_v18  ;;  %v4299_v61 = vld [vmem:[#allocation52_spill] sm:$0xff]  ;;  %2826 = vrcp.f32 %v1349_v5 }
 0x1e9   :  { %v4047_v34 = vmul.f32 %v1532_v38, %v995_v12  ;;  %v2809_v63 = vpop.eup %2808  ;;  %v1352_v14 = vadd.f32 1.0, %v2807_v9  ;;  %2828 = vrcp.f32 %v1350_v54 }
 0x1ea   :  { %v1699_v30 = vpack.c.bf16 %v4045_v8, %v4034_v29  ;;  %v2811_v36 = vpop.eup %2810  ;;  %v1536_v62 = vmul.f32 %v2809_v63, %v4299_v61  ;;  %2830 = vrcp.f32 %v1351_v51 }
 0x1eb   :  { %v998_v10 = vpop.f32.mrb[80].mxu1  ;;  %v1700_v50 = vpack.c.bf16 %v4047_v34, %v4039_v25  ;;  %v2813_v27 = vpop.eup %2812  ;;  %2832 = vrcp.f32 %v1352_v14  ;;  %v1537_v7 = vmul.f32 %v2811_v36, %v4300_v1 }
 0x1ec   :  { %v999_v16 = vadd.f32 %v998_v10, %v3389_v31  ;;  %v1000_v22 = vpop.f32.mrb[81].mxu1  ;;  %v2815_v52 = vpop.eup %2814 }
 0x1ed   :  { %v1001_v32 = vadd.f32 %v1000_v22, %v3392_v24  ;;  %v1002_v56 = vpop.f32.mrb[82].mxu1  ;;  %v2817_v23 = vpop.eup %2816 }
 0x1ee   :  { %v4060_v39 = vmul.f32 %v1533_v35, %v999_v16  ;;  %v1003_v43 = vadd.f32 %v1002_v56, %v3389_v31  ;;  %v1004_v15 = vpop.f32.mrb[83].mxu1  ;;  %2014 = vmatmul.mubr.bf16.gmra.mrb[64].mxu0 %v1693_v40  ;;  %v2819_v38 = vpop.eup %2818  ;;  %v1353_v40 = vadd.f32 1.0, %v2817_v23  ;;  %v1538_v35 = vmul.f32 %v2813_v27, %v4301_v11 }
 0x1ef   :  { %v4067_v21 = vmul.f32 %v1534_v26, %v1001_v32  ;;  %v1005_v42 = vadd.f32 %v1004_v15, %v3392_v24  ;;  %2023 = vmatprep.mubr.bf16.mxu0 %v1696_v33  ;;  %v2821_v53 = vpop.eup %2820  ;;  %v1354_v33 = vadd.f32 1.0, %v2819_v38  ;;  %v1539_v26 = vmul.f32 %v2815_v52, %v4302_v19 }
 0x1f0   :  { %v4073_v13 = vmul.f32 %v1535_v57, %v1003_v43  ;;  %v2823_v58 = vpop.eup %2822  ;;  %v1355_v54 = vadd.f32 1.0, %v2821_v53  ;;  %2834 = vrcp.f32 %v1353_v40  ;;  %v4303_v57 = vpack.c.bf16 %v3977_v48, %v3957_v0 }
 0x1f1   :  { %v4075_v12 = vmul.f32 %v1536_v62, %v1005_v42  ;;  %v2825_v5 = vpop.eup %2824  ;;  %v1356_v51 = vadd.f32 1.0, %v2823_v58  ;;  %2836 = vrcp.f32 %v1354_v33 }
 0x1f2   :  { %v1701_v20 = vpack.c.bf16 %v4073_v13, %v4060_v39  ;;  %v1540_v36 = vmul.f32 %v2825_v5, %v4268_v45  ;;  %v2827_v15 = vpop.eup %2826  ;;  %2838 = vrcp.f32 %v1355_v54 }
 0x1f3   :  { %v1008_v37 = vpop.f32.mrb[84].mxu1  ;;  %v1702_v9 = vpack.c.bf16 %v4075_v12, %v4067_v21  ;;  %v2829_v61 = vpop.eup %2828  ;;  %2840 = vrcp.f32 %v1356_v51  ;;  %v1541_v23 = vmul.f32 %v2827_v15, %v3816_v17 }
 0x1f4   :  { %v1009_v10 = vadd.f32 %v1008_v37, %v3389_v31  ;;  %v1010_v63 = vpop.f32.mrb[85].mxu1  ;;  %v2831_v62 = vpop.eup %2830  ;;  %v1542_v46 = vmul.f32 %v2829_v61, %v3823_v59 }
 0x1f5   :  { %v1011_v16 = vadd.f32 %v1010_v63, %v3392_v24  ;;  %v1012_v22 = vpop.f32.mrb[86].mxu1  ;;  %v2833_v48 = vpop.eup %2832  ;;  %v1543_v58 = vmul.f32 %v2831_v62, %v3835_v41 }
 0x1f6   :  { %v4086_v32 = vmul.f32 %v1537_v7, %v1009_v10  ;;  %v1013_v56 = vadd.f32 %v1012_v22, %v3389_v31  ;;  %v1014_v18 = vpop.f32.mrb[87].mxu1  ;;  %2024 = vmatmul.mubr.bf16.gmra.mrb[68].mxu0 %v4303_v57  ;;  %v1544_v1 = vmul.f32 %v2833_v48, %v3841_v6 }
 0x1f7   :  { %v1602_v27 = vmul.f32 %v1538_v35, %v1011_v16  ;;  %v1015_v14 = vadd.f32 %v1014_v18, %v3392_v24  ;;  %2033 = vmatprep.mubr.bf16.mxu0 %v1698_v55 }
 0x1f8   :  { %v1603_v43 = vmul.f32 %v1539_v26, %v1013_v56 }
 0x1f9   :  { %v1604_v52 = vmul.f32 %v1540_v36, %v1015_v14 }
 0x1fa   :  { %v1703_v45 = vpack.c.bf16 %v1603_v43, %v4086_v32  ;;  %v2835_v33 = vpop.eup %2834 }
 0x1fb   :  { %v1018_v42 = vpop.f32.mrb[88].mxu1  ;;  %v1704_v0 = vpack.c.bf16 %v1604_v52, %v1602_v27  ;;  %v2837_v10 = vpop.eup %2836  ;;  %v1545_v16 = vmul.f32 %v2835_v33, %v3871_v44 }
 0x1fc   :  { %v1019_v38 = vadd.f32 %v1018_v42, %v3389_v31  ;;  %v1020_v53 = vpop.f32.mrb[89].mxu1  ;;  %v2839_v11 = vpop.eup %2838 }
 0x1fd   :  { %v1021_v2 = vadd.f32 %v1020_v53, %v3392_v24  ;;  %v1022_v55 = vpop.f32.mrb[90].mxu1  ;;  %v2841_v6 = vpop.eup %2840  ;;  %v1547_v34 = vmul.f32 %v2839_v11, %v3954_v47 }
 0x1fe   :  { %v1605_v40 = vmul.f32 %v1541_v23, %v1019_v38  ;;  %v1023_v37 = vadd.f32 %v1022_v55, %v3389_v31  ;;  %v1024_v5 = vpop.f32.mrb[91].mxu1  ;;  %2034 = vmatmul.mubr.bf16.gmra.mrb[72].mxu0 %v1697_v49  ;;  %v1546_v49 = vmul.f32 %v2837_v10, %v3921_v3  ;;  %v1548_v51 = vmul.f32 %v2841_v6, %v3971_v60 }
 0x1ff   :  { %v1606_v17 = vmul.f32 %v1542_v46, %v1021_v2  ;;  %v1025_v7 = vadd.f32 %v1024_v5, %v3392_v24  ;;  %2043 = vmatprep.mubr.bf16.mxu0 %v1700_v50 }
 0x200   :  { %v1607_v59 = vmul.f32 %v1543_v58, %v1023_v37 }
 0x201   :  { %v1608_v41 = vmul.f32 %v1544_v1, %v1025_v7 }
 0x202   :  { %v1705_v63 = vpack.c.bf16 %v1607_v59, %v1605_v40 }
 0x203   :  { %v1028_v35 = vpop.f32.mrb[92].mxu1  ;;  %v1706_v54 = vpack.c.bf16 %v1608_v41, %v1606_v17 }
 0x204   :  { %v1029_v28 = vadd.f32 %v1028_v35, %v3389_v31  ;;  %v1030_v4 = vpop.f32.mrb[93].mxu1 }
 0x205   :  { %v1031_v22 = vadd.f32 %v1030_v4, %v3392_v24  ;;  %v1032_v25 = vpop.f32.mrb[94].mxu1 }
 0x206   :  { %v1609_v50 = vmul.f32 %v1545_v16, %v1029_v28  ;;  %v1033_v19 = vadd.f32 %v1032_v25, %v3389_v31  ;;  %v1034_v26 = vpop.f32.mrb[95].mxu1  ;;  %2044 = vmatmul.mubr.bf16.gmra.mrb[76].mxu0 %v1699_v30 }
 0x207   :  { %v1610_v44 = vmul.f32 %v1546_v49, %v1031_v22  ;;  %v1035_v32 = vadd.f32 %v1034_v26, %v3392_v24  ;;  %2053 = vmatprep.mubr.bf16.mxu0 %v1702_v9 }
 0x208   :  { %v1611_v3 = vmul.f32 %v1547_v34, %v1033_v19 }
 0x209   :  { %v1612_v56 = vmul.f32 %v1548_v51, %v1035_v32 }
 0x20a   :  { %v1707_v47 = vpack.c.bf16 %v1611_v3, %v1609_v50 }
 0x20b   :  { %v1708_v18 = vpack.c.bf16 %v1612_v56, %v1610_v44 }
 0x20e   :  { %2054 = vmatmul.mubr.bf16.gmra.mrb[80].mxu0 %v1701_v20 }
 0x20f   :  { %2063 = vmatprep.mubr.bf16.mxu0 %v1704_v0 }
 0x216   :  { %2064 = vmatmul.mubr.bf16.gmra.mrb[84].mxu0 %v1703_v45 }
 0x217   :  { %2073 = vmatprep.mubr.bf16.mxu0 %v1706_v54 }
 0x21e   :  { %2074 = vmatmul.mubr.bf16.gmra.mrb[88].mxu0 %v1705_v63 }
 0x21f   :  { %2083 = vmatprep.mubr.bf16.mxu0 %v1708_v18 }
 0x226   :  { %2084 = vmatmul.mubr.bf16.gmra.mrb[92].mxu0 %v1707_v47 }
 0x27f   :  { %v1935_v31 = vpop.f32.mrb[32].mxu0 }
 0x280   :  { %v1937_v24 = vpop.f32.mrb[33].mxu0  ;;  %2158 = vst [vmem:[#allocation8] sm:$0xff] %v1935_v31 }
 0x281   :  { %v1939_v60 = vpop.f32.mrb[34].mxu0  ;;  %2159 = vst [vmem:[#allocation8 + $0x8] sm:$0xff] %v1937_v24 }
 0x282   :  { %v1941_v29 = vpop.f32.mrb[35].mxu0  ;;  %2160 = vst [vmem:[#allocation8 + $0x10] sm:$0xff] %v1939_v60 }
 0x283   :  { %2161 = vst [vmem:[#allocation8 + $0x18] sm:$0xff] %v1941_v29 }
 0x287   :  { %v1945_v8 = vpop.f32.mrb[36].mxu0 }
 0x288   :  { %v1947_v30 = vpop.f32.mrb[37].mxu0  ;;  %2162 = vst [vmem:[#allocation8 + $0x20] sm:$0xff] %v1945_v8 }
 0x289   :  { %v1949_v21 = vpop.f32.mrb[38].mxu0  ;;  %2163 = vst [vmem:[#allocation8 + $0x28] sm:$0xff] %v1947_v30 }
 0x28a   :  { %v1951_v39 = vpop.f32.mrb[39].mxu0  ;;  %2164 = vst [vmem:[#allocation8 + $0x30] sm:$0xff] %v1949_v21 }
 0x28b   :  { %2165 = vst [vmem:[#allocation8 + $0x38] sm:$0xff] %v1951_v39 }
 0x28f   :  { %v1955_v13 = vpop.f32.mrb[40].mxu0 }
 0x290   :  { %v1957_v12 = vpop.f32.mrb[41].mxu0  ;;  %2166 = vst [vmem:[#allocation8 + $0x40] sm:$0xff] %v1955_v13 }
 0x291   :  { %v1959_v20 = vpop.f32.mrb[42].mxu0  ;;  %2167 = vst [vmem:[#allocation8 + $0x48] sm:$0xff] %v1957_v12 }
 0x292   :  { %v1961_v9 = vpop.f32.mrb[43].mxu0  ;;  %2168 = vst [vmem:[#allocation8 + $0x50] sm:$0xff] %v1959_v20 }
 0x293   :  { %2169 = vst [vmem:[#allocation8 + $0x58] sm:$0xff] %v1961_v9 }
 0x297   :  { %v1965_v36 = vpop.f32.mrb[44].mxu0 }
 0x298   :  { %v1967_v57 = vpop.f32.mrb[45].mxu0  ;;  %2170 = vst [vmem:[#allocation8 + $0x60] sm:$0xff] %v1965_v36 }
 0x299   :  { %v1969_v27 = vpop.f32.mrb[46].mxu0  ;;  %2171 = vst [vmem:[#allocation8 + $0x68] sm:$0xff] %v1967_v57 }
 0x29a   :  { %v1971_v14 = vpop.f32.mrb[47].mxu0  ;;  %2172 = vst [vmem:[#allocation8 + $0x70] sm:$0xff] %v1969_v27 }
 0x29b   :  { %2173 = vst [vmem:[#allocation8 + $0x78] sm:$0xff] %v1971_v14 }
 0x29f   :  { %v1975_v43 = vpop.f32.mrb[48].mxu0 }
 0x2a0   :  { %v1977_v15 = vpop.f32.mrb[49].mxu0  ;;  %2174 = vst [vmem:[#allocation8 + $0x80] sm:$0xff] %v1975_v43 }
 0x2a1   :  { %v1979_v52 = vpop.f32.mrb[50].mxu0  ;;  %2175 = vst [vmem:[#allocation8 + $0x88] sm:$0xff] %v1977_v15 }
 0x2a2   :  { %v1981_v61 = vpop.f32.mrb[51].mxu0  ;;  %2176 = vst [vmem:[#allocation8 + $0x90] sm:$0xff] %v1979_v52 }
 0x2a3   :  { %2177 = vst [vmem:[#allocation8 + $0x98] sm:$0xff] %v1981_v61 }
 0x2a9   :  { %v1985_v45 = vpop.f32.mrb[52].mxu0 }
 0x2aa   :  { %v1987_v62 = vpop.f32.mrb[53].mxu0  ;;  %2178 = vst [vmem:[#allocation8 + $0xa0] sm:$0xff] %v1985_v45 }
 0x2ab   :  { %v1989_v42 = vpop.f32.mrb[54].mxu0  ;;  %2179 = vst [vmem:[#allocation8 + $0xa8] sm:$0xff] %v1987_v62 }
 0x2ac   :  { %v1991_v0 = vpop.f32.mrb[55].mxu0  ;;  %2180 = vst [vmem:[#allocation8 + $0xb0] sm:$0xff] %v1989_v42 }
 0x2ad   :  { %2181 = vst [vmem:[#allocation8 + $0xb8] sm:$0xff] %v1991_v0 }
 0x2b1   :  { %v1995_v48 = vpop.f32.mrb[56].mxu0 }
 0x2b2   :  { %v1997_v23 = vpop.f32.mrb[57].mxu0  ;;  %2182 = vst [vmem:[#allocation8 + $0xc0] sm:$0xff] %v1995_v48 }
 0x2b3   :  { %v1999_v38 = vpop.f32.mrb[58].mxu0  ;;  %2183 = vst [vmem:[#allocation8 + $0xc8] sm:$0xff] %v1997_v23 }
 0x2b4   :  { %v2001_v53 = vpop.f32.mrb[59].mxu0  ;;  %2184 = vst [vmem:[#allocation8 + $0xd0] sm:$0xff] %v1999_v38 }
 0x2b5   :  { %2185 = vst [vmem:[#allocation8 + $0xd8] sm:$0xff] %v2001_v53 }
 0x2b9   :  { %v2005_v46 = vpop.f32.mrb[60].mxu0 }
 0x2ba   :  { %v2007_v2 = vpop.f32.mrb[61].mxu0  ;;  %2186 = vst [vmem:[#allocation8 + $0xe0] sm:$0xff] %v2005_v46 }
 0x2bb   :  { %v2009_v55 = vpop.f32.mrb[62].mxu0  ;;  %2187 = vst [vmem:[#allocation8 + $0xe8] sm:$0xff] %v2007_v2 }
 0x2bc   :  { %v2011_v58 = vpop.f32.mrb[63].mxu0  ;;  %2188 = vst [vmem:[#allocation8 + $0xf0] sm:$0xff] %v2009_v55 }
 0x2bd   :  { %2189 = vst [vmem:[#allocation8 + $0xf8] sm:$0xff] %v2011_v58 }
 0x2c1   :  { %v2015_v40 = vpop.f32.mrb[64].mxu0 }
 0x2c2   :  { %v2017_v37 = vpop.f32.mrb[65].mxu0  ;;  %2190 = vst [vmem:[#allocation8 + $0x100] sm:$0xff] %v2015_v40 }
 0x2c3   :  { %v2019_v5 = vpop.f32.mrb[66].mxu0  ;;  %2191 = vst [vmem:[#allocation8 + $0x108] sm:$0xff] %v2017_v37 }
 0x2c4   :  { %v2021_v1 = vpop.f32.mrb[67].mxu0  ;;  %2192 = vst [vmem:[#allocation8 + $0x110] sm:$0xff] %v2019_v5 }
 0x2c5   :  { %2193 = vst [vmem:[#allocation8 + $0x118] sm:$0xff] %v2021_v1 }
 0x2c9   :  { %v2025_v17 = vpop.f32.mrb[68].mxu0 }
 0x2ca   :  { %v2027_v7 = vpop.f32.mrb[69].mxu0  ;;  %2194 = vst [vmem:[#allocation8 + $0x120] sm:$0xff] %v2025_v17 }
 0x2cb   :  { %v2029_v59 = vpop.f32.mrb[70].mxu0  ;;  %2195 = vst [vmem:[#allocation8 + $0x128] sm:$0xff] %v2027_v7 }
 0x2cc   :  { %v2031_v33 = vpop.f32.mrb[71].mxu0  ;;  %2196 = vst [vmem:[#allocation8 + $0x130] sm:$0xff] %v2029_v59 }
 0x2cd   :  { %2197 = vst [vmem:[#allocation8 + $0x138] sm:$0xff] %v2031_v33 }
 0x2d1   :  { %v2035_v41 = vpop.f32.mrb[72].mxu0 }
 0x2d2   :  { %v2037_v10 = vpop.f32.mrb[73].mxu0  ;;  %2198 = vst [vmem:[#allocation8 + $0x140] sm:$0xff] %v2035_v41 }
 0x2d3   :  { %v2039_v63 = vpop.f32.mrb[74].mxu0  ;;  %2199 = vst [vmem:[#allocation8 + $0x148] sm:$0xff] %v2037_v10 }
 0x2d4   :  { %v2041_v11 = vpop.f32.mrb[75].mxu0  ;;  %2200 = vst [vmem:[#allocation8 + $0x150] sm:$0xff] %v2039_v63 }
 0x2d5   :  { %2201 = vst [vmem:[#allocation8 + $0x158] sm:$0xff] %v2041_v11 }
 0x2d9   :  { %v2045_v35 = vpop.f32.mrb[76].mxu0 }
 0x2da   :  { %v2047_v54 = vpop.f32.mrb[77].mxu0  ;;  %2202 = vst [vmem:[#allocation8 + $0x160] sm:$0xff] %v2045_v35 }
 0x2db   :  { %v2049_v6 = vpop.f32.mrb[78].mxu0  ;;  %2203 = vst [vmem:[#allocation8 + $0x168] sm:$0xff] %v2047_v54 }
 0x2dc   :  { %v2051_v16 = vpop.f32.mrb[79].mxu0  ;;  %2204 = vst [vmem:[#allocation8 + $0x170] sm:$0xff] %v2049_v6 }
 0x2dd   :  { %2205 = vst [vmem:[#allocation8 + $0x178] sm:$0xff] %v2051_v16 }
 0x2e1   :  { %v2055_v28 = vpop.f32.mrb[80].mxu0 }
 0x2e2   :  { %v2057_v4 = vpop.f32.mrb[81].mxu0  ;;  %2206 = vst [vmem:[#allocation8 + $0x180] sm:$0xff] %v2055_v28 }
 0x2e3   :  { %v2059_v49 = vpop.f32.mrb[82].mxu0  ;;  %2207 = vst [vmem:[#allocation8 + $0x188] sm:$0xff] %v2057_v4 }
 0x2e4   :  { %v2061_v22 = vpop.f32.mrb[83].mxu0  ;;  %2208 = vst [vmem:[#allocation8 + $0x190] sm:$0xff] %v2059_v49 }
 0x2e5   :  { %2209 = vst [vmem:[#allocation8 + $0x198] sm:$0xff] %v2061_v22 }
 0x2e9   :  { %v2065_v25 = vpop.f32.mrb[84].mxu0 }
 0x2ea   :  { %v2067_v34 = vpop.f32.mrb[85].mxu0  ;;  %2210 = vst [vmem:[#allocation8 + $0x1a0] sm:$0xff] %v2065_v25 }
 0x2eb   :  { %v2069_v50 = vpop.f32.mrb[86].mxu0  ;;  %2211 = vst [vmem:[#allocation8 + $0x1a8] sm:$0xff] %v2067_v34 }
 0x2ec   :  { %v2071_v19 = vpop.f32.mrb[87].mxu0  ;;  %2212 = vst [vmem:[#allocation8 + $0x1b0] sm:$0xff] %v2069_v50 }
 0x2ed   :  { %2213 = vst [vmem:[#allocation8 + $0x1b8] sm:$0xff] %v2071_v19 }
 0x2f1   :  { %v2075_v26 = vpop.f32.mrb[88].mxu0 }
 0x2f2   :  { %v2077_v51 = vpop.f32.mrb[89].mxu0  ;;  %2214 = vst [vmem:[#allocation8 + $0x1c0] sm:$0xff] %v2075_v26 }
 0x2f3   :  { %v2079_v44 = vpop.f32.mrb[90].mxu0  ;;  %2215 = vst [vmem:[#allocation8 + $0x1c8] sm:$0xff] %v2077_v51 }
 0x2f4   :  { %v2081_v32 = vpop.f32.mrb[91].mxu0  ;;  %2216 = vst [vmem:[#allocation8 + $0x1d0] sm:$0xff] %v2079_v44 }
 0x2f5   :  { %2217 = vst [vmem:[#allocation8 + $0x1d8] sm:$0xff] %v2081_v32 }
 0x2f9   :  { %v2085_v3 = vpop.f32.mrb[92].mxu0 }
 0x2fa   :  { %v2087_v56 = vpop.f32.mrb[93].mxu0  ;;  %2218 = vst [vmem:[#allocation8 + $0x1e0] sm:$0xff] %v2085_v3 }
 0x2fb   :  { %v2089_v47 = vpop.f32.mrb[94].mxu0  ;;  %2219 = vst [vmem:[#allocation8 + $0x1e8] sm:$0xff] %v2087_v56 }
 0x2fc   :  { %v2091_v18 = vpop.f32.mrb[95].mxu0  ;;  %2220 = vst [vmem:[#allocation8 + $0x1f0] sm:$0xff] %v2089_v47 }
 0x2fd   :  { %2221 = vst [vmem:[#allocation8 + $0x1f8] sm:$0xff] %v2091_v18 }
 0x2fe   :  { %2919 = shalt.err (!%p2916_p0)
}
 0x2ff   :  { %s2920_s8 = scalar_lea.hbm %s4148_s4, 8192 }
 0x300   :  { %p2921_p1 = scmp.ne.s32.totalorder %s4148_s4, %s2920_s8  ;;  %p2924_p2 = scmp.lt.u32.totalorder %s2920_s8, %s4148_s4 }
 0x302   :  { %p2926_p3 = pnand %p2924_p2, %p2921_p1 }
 0x304   :  { %2929 = shalt.err (!%p2926_p3)
}
 0x305   :  { %2233 = dma.vmem_to_hbm [thread:$0]  %s2228_s30, 8192, %s4148_s4, [#allocation4], %s2940_s1, %s2940_s1, %s2941_s13  }
 0x306   :  { %2934 = dma.done.wait [#allocation4], 8192  }
 0x307   :  { %2935 = vsyncadd [#allocation4], 4294959104 }
 0x308   :  { %2237 = vsyncpa [#allocation3], 1 }
 0x309   :  { %2238 = vsyncpa [#allocation6], 1 }
 0x30a   :  { %2239 = vsyncpa [#allocation4], 1 }

</bundles_post_ra>
